<compile_context>
chip_gen: v7x
topology: tpu7x:2x2x1
jax: 0.10.0
libtpu: 0.0.40
codegen_flags: <defaults>
</compile_context>

<pallas_src>
import jax
import jax.numpy as jnp
from jax.experimental import pallas as pl
from jax.experimental.pallas import tpu as pltpu

F32 = jnp.float32
BF16 = jnp.bfloat16


def _round_up(x, m):
    return (x + m - 1) // m * m


# --------------------------- edge-network kernel ----------------------------

def _edge_net_kernel(ef_ref, w1_ref, b1_ref, w2_ref, b2_ref, we_ref):
    hid = jnp.dot(ef_ref[...], w1_ref[...], preferred_element_type=jnp.float32) + b1_ref[...]
    hid = jnp.maximum(hid, 0.0)
    we = jnp.dot(hid, w2_ref[...], preferred_element_type=jnp.float32) + b2_ref[...]
    we_ref[...] = we.astype(BF16)


def edge_network(edge_feats, w1, b1, w2, b2, *, e_tile):
    e_pad, edge_in = edge_feats.shape
    ehid = w1.shape[1]
    dd = w2.shape[1]
    n_tiles = e_pad // e_tile
    return pl.pallas_call(
        _edge_net_kernel,
        out_shape=jax.ShapeDtypeStruct((e_pad, dd), BF16),
        grid_spec=pltpu.PrefetchScalarGridSpec(
            num_scalar_prefetch=0,
            grid=(n_tiles,),
            in_specs=[
                pl.BlockSpec((e_tile, edge_in), lambda t: (t, 0)),
                pl.BlockSpec((edge_in, ehid), lambda t: (0, 0)),
                pl.BlockSpec((1, ehid), lambda t: (0, 0)),
                pl.BlockSpec((ehid, dd), lambda t: (0, 0)),
                pl.BlockSpec((1, dd), lambda t: (0, 0)),
            ],
            out_specs=pl.BlockSpec((e_tile, dd), lambda t: (t, 0)),
        ),
        compiler_params=pltpu.CompilerParams(
            dimension_semantics=("parallel",),
            vmem_limit_bytes=32 * 1024 * 1024,
        ),
    )(edge_feats, w1, b1, w2, b2)


# -------------- fused message-passing + Set2Set + head kernel ---------------

def _lstm_cell(x, h, c, wi, wh, bi, bh, d):
    g = (jnp.dot(x, wi, preferred_element_type=jnp.float32) + bi
         + jnp.dot(h, wh, preferred_element_type=jnp.float32) + bh)
    i = jax.nn.sigmoid(g[:, 0:d])
    f = jax.nn.sigmoid(g[:, d:2 * d])
    gg = jnp.tanh(g[:, 2 * d:3 * d])
    o = jax.nn.sigmoid(g[:, 3 * d:4 * d])
    c_new = f * c + i * gg
    return o * jnp.tanh(c_new), c_new


def _make_mp_s2s_kernel(d, n_lstm_layers, num_s2s_steps):
    n_lstm_refs = 4 * n_lstm_layers

    def kernel(nf_ref, pw_ref, pb_ref, cb_ref, gwi_ref, gwh_ref, gbi_ref, gbh_ref,
               gat_ref, dst_ref, we_ref, mem_ref, *args):
        lstm_refs = args[:n_lstm_refs]
        pw1_ref, pb1_ref, pw2_ref, pb2_ref = args[n_lstm_refs:n_lstm_refs + 4]
        out_ref = args[n_lstm_refs + 4]
        h_sc = args[n_lstm_refs + 5]          # node state / GRU hidden, resident in VMEM
        m_acc = args[n_lstm_refs + 6]         # per-step scatter accumulator, resident in VMEM

        s = pl.program_id(0)                  # message-passing step
        t = pl.program_id(1)                  # edge tile
        n_tiles = pl.num_programs(1)
        last_s = pl.num_programs(0) - 1

        # fused node projection (Linear + ReLU); also initializes the GRU hidden state
        @pl.when(jnp.logical_and(s == 0, t == 0))
        def _():
            h0 = jnp.dot(nf_ref[...], pw_ref[...], preferred_element_type=jnp.float32)
            h_sc[...] = jnp.maximum(h0 + pb_ref[...], 0.0)
            out_ref[...] = jnp.zeros_like(out_ref)

        @pl.when(t == 0)
        def _():
            m_acc[...] = jnp.zeros_like(m_acc)

        # gather source node features for this edge tile: (Et, Vp) @ (Vp, D) -> (Et, D)
        h_bf = h_sc[...].astype(BF16)
        h_src = jnp.dot(gat_ref[...], h_bf, preferred_element_type=jnp.float32)

        # per-edge message m_e = h_src[e] @ W_e : batched matmul over the edge dim
        msgs = jax.lax.dot_general(
            h_src.astype(BF16), we_ref[...],
            dimension_numbers=(((1,), (1,)), ((0,), (0,))),
            preferred_element_type=jnp.float32)                           # (Et, D)

        # scatter-add over destination nodes: dst_oh^T @ msgs -> (Vp, D)
        m_acc[...] += jax.lax.dot_general(
            dst_ref[...], msgs.astype(BF16),
            dimension_numbers=(((0,), (0,)), ((), ())),
            preferred_element_type=jnp.float32)

        # after the last edge tile of this step: NNConv bias + ReLU, then GRU update
        @pl.when(t == n_tiles - 1)
        def _():
            m = jnp.maximum(m_acc[...] + cb_ref[...], 0.0)
            h = h_sc[...]
            gi = jnp.dot(m, gwi_ref[...], preferred_element_type=jnp.float32) + gbi_ref[...]
            gh = jnp.dot(h, gwh_ref[...], preferred_element_type=jnp.float32) + gbh_ref[...]
            r = jax.nn.sigmoid(gi[:, 0:d] + gh[:, 0:d])
            z = jax.nn.sigmoid(gi[:, d:2 * d] + gh[:, d:2 * d])
            n = jnp.tanh(gi[:, 2 * d:3 * d] + r * gh[:, 2 * d:3 * d])
            h_sc[...] = (1.0 - z) * n + z * h

        # final grid point: fused Set2Set readout + 2-layer prediction MLP
        # (h never leaves VMEM; the whole readout loop is unrolled on resident data)
        @pl.when(jnp.logical_and(s == last_s, t == n_tiles - 1))
        def _():
            feat = h_sc[...]                                              # (Vp, D)
            mem = mem_ref[...]                                            # (B, Vp)
            b = mem.shape[0]

            # hoist LSTM weight loads out of the unrolled readout loop
            lstm_w = [tuple(lstm_refs[4 * layer + k][...] for k in range(4))
                      for layer in range(n_lstm_layers)]

            q_star = jnp.zeros((b, 2 * d), jnp.float32)
            hs = [jnp.zeros((b, d), jnp.float32) for _ in range(n_lstm_layers)]
            cs = [jnp.zeros((b, d), jnp.float32) for _ in range(n_lstm_layers)]

            for _ in range(num_s2s_steps):
                # stacked LSTM on q_star (layer 0 input 2D, layers >0 input D)
                x = q_star
                for layer in range(n_lstm_layers):
                    wi, wh, bi, bh = lstm_w[layer]
                    hs[layer], cs[layer] = _lstm_cell(x, hs[layer], cs[layer],
                                                      wi, wh, bi, bh, d)
                    x = hs[layer]
                q = x                                                     # (B, D)

                # per-graph masked softmax attention over nodes + weighted readout
                scores = jax.lax.dot_general(q, feat, (((1,), (1,)), ((), ())),
                                             preferred_element_type=jnp.float32)  # (B, Vp)
                masked = jnp.where(mem > 0, scores, -1e30)
                mx = jnp.max(masked, axis=1, keepdims=True)
                ex = jnp.where(mem > 0, jnp.exp(masked - mx), 0.0)
                denom = jnp.maximum(jnp.sum(ex, axis=1, keepdims=True), 1e-20)
                alpha = ex / denom
                readout = jnp.dot(alpha, feat, preferred_element_type=jnp.float32)  # (B, D)
                q_star = jnp.concatenate([q, readout], axis=-1)

            z1 = jnp.maximum(
                jnp.dot(q_star, pw1_ref[...], preferred_element_type=jnp.float32)
                + pb1_ref[...], 0.0)
            out_ref[...] = (jnp.dot(z1, pw2_ref[...], preferred_element_type=jnp.float32)
                            + pb2_ref[...])

    return kernel


def mp_s2s_predict(node_feats, params, gather_oh, dst_oh, w_e, member, *,
                   num_mp_steps, num_s2s_steps, n_lstm_layers, n_tasks, e_tile):
    v_pad, node_in = node_feats.shape
    e_pad = gather_oh.shape[0]
    d = w_e.shape[-1]
    b = member.shape[0]
    n_tiles = e_pad // e_tile
    const2 = lambda s, t: (0, 0)

    in_specs = [
        pl.BlockSpec((v_pad, node_in), const2),                 # node feats (resident)
        pl.BlockSpec((node_in, d), const2),                     # proj_w
        pl.BlockSpec((1, d), const2),                           # proj_b
        pl.BlockSpec((1, d), const2),                           # nnconv bias
        pl.BlockSpec((d, 3 * d), const2),                       # gru_wi
        pl.BlockSpec((d, 3 * d), const2),                       # gru_wh
        pl.BlockSpec((1, 3 * d), const2),                       # gru_bi
        pl.BlockSpec((1, 3 * d), const2),                       # gru_bh
        pl.BlockSpec((e_tile, v_pad), lambda s, t: (t, 0)),     # src one-hot (bf16)
        pl.BlockSpec((e_tile, v_pad), lambda s, t: (t, 0)),     # dst one-hot (bf16)
        pl.BlockSpec((e_tile, d, d), lambda s, t: (t, 0, 0)),   # per-edge weights (bf16)
        pl.BlockSpec((b, v_pad), const2),                       # graph membership mask
    ]
    inputs = [node_feats,
              params['proj_w'], params['proj_b'].reshape(1, d),
              params['nnconv_b'].reshape(1, d),
              params['gru_wi'], params['gru_wh'],
              params['gru_bi'].reshape(1, 3 * d), params['gru_bh'].reshape(1, 3 * d),
              gather_oh, dst_oh, w_e, member]
    for layer in range(n_lstm_layers):
        lp = params['lstm'][layer]
        in_dim = 2 * d if layer == 0 else d
        in_specs += [pl.BlockSpec((in_dim, 4 * d), const2),
                     pl.BlockSpec((d, 4 * d), const2),
                     pl.BlockSpec((1, 4 * d), const2),
                     pl.BlockSpec((1, 4 * d), const2)]
        inputs += [lp['wi'], lp['wh'], lp['bi'].reshape(1, -1), lp['bh'].reshape(1, -1)]
    in_specs += [pl.BlockSpec((2 * d, d), const2),
                 pl.BlockSpec((1, d), const2),
                 pl.BlockSpec((d, n_tasks), const2),
                 pl.BlockSpec((1, n_tasks), const2)]
    inputs += [params['pred_w1'], params['pred_b1'].reshape(1, -1),
               params['pred_w2'], params['pred_b2'].reshape(1, -1)]

    cost = pl.CostEstimate(
        flops=int(num_mp_steps * (4 * e_pad * v_pad * d + 2 * e_pad * d * d
                                  + 12 * v_pad * d * d)
                  + num_s2s_steps * (16 * n_lstm_layers * b * d * d + 4 * b * v_pad * d)),
        transcendentals=int(num_mp_steps * 3 * v_pad * d
                            + num_s2s_steps * (5 * n_lstm_layers * b * d + b * v_pad)),
        bytes_accessed=int(num_mp_steps * (2 * e_pad * d * d + 4 * e_pad * v_pad)
                           + 4 * v_pad * d + 4 * b * n_tasks),
    )

    kernel = _make_mp_s2s_kernel(d, n_lstm_layers, num_s2s_steps)
    return pl.pallas_call(
        kernel,
        out_shape=jax.ShapeDtypeStruct((b, n_tasks), F32),
        grid_spec=pltpu.PrefetchScalarGridSpec(
            num_scalar_prefetch=0,
            grid=(num_mp_steps, n_tiles),
            in_specs=in_specs,
            out_specs=pl.BlockSpec((b, n_tasks), const2),
            scratch_shapes=[pltpu.VMEM((v_pad, d), F32),        # h / GRU hidden
                            pltpu.VMEM((v_pad, d), F32)],       # message accumulator
        ),
        compiler_params=pltpu.CompilerParams(
            dimension_semantics=("arbitrary", "arbitrary"),
            vmem_limit_bytes=32 * 1024 * 1024,
        ),
        cost_estimate=cost,
    )(*inputs)


# --------------------------- parameter init (glue) ---------------------------

def _init_linear(key, fan_in, fan_out):
    kw, kb = jax.random.split(key)
    bound = 1.0 / (fan_in ** 0.5)
    w = jax.random.uniform(kw, (fan_in, fan_out), F32, -bound, bound)
    b = jax.random.uniform(kb, (fan_out,), F32, -bound, bound)
    return w, b


def init_params(key, node_in, edge_in, d=64, e_hidden=128, n_tasks=2, n_lstm_layers=3):
    keys = jax.random.split(key, 16)
    p = {}
    p['proj_w'], p['proj_b'] = _init_linear(keys[0], node_in, d)
    p['en_w1'], p['en_b1'] = _init_linear(keys[1], edge_in, e_hidden)
    p['en_w2'], p['en_b2'] = _init_linear(keys[2], e_hidden, d * d)
    p['nnconv_b'] = jnp.zeros((d,), F32)                       # DGL NNConv bias init = zeros
    bound = 1.0 / (d ** 0.5)
    # GRU (gate order r, z, n), weights stored transposed: (in, 3D)
    p['gru_wi'] = jax.random.uniform(keys[3], (d, 3 * d), F32, -bound, bound)
    p['gru_wh'] = jax.random.uniform(keys[4], (d, 3 * d), F32, -bound, bound)
    p['gru_bi'] = jax.random.uniform(keys[5], (3 * d,), F32, -bound, bound)
    p['gru_bh'] = jax.random.uniform(keys[6], (3 * d,), F32, -bound, bound)
    # Set2Set LSTM: layer 0 input 2D, layers >0 input D; hidden D (gate order i, f, g, o)
    lstm = []
    for layer in range(n_lstm_layers):
        in_dim = 2 * d if layer == 0 else d
        k = jax.random.split(keys[7 + layer], 4)
        lstm.append(dict(
            wi=jax.random.uniform(k[0], (in_dim, 4 * d), F32, -bound, bound),
            wh=jax.random.uniform(k[1], (d, 4 * d), F32, -bound, bound),
            bi=jax.random.uniform(k[2], (4 * d,), F32, -bound, bound),
            bh=jax.random.uniform(k[3], (4 * d,), F32, -bound, bound),
        ))
    p['lstm'] = lstm
    p['pred_w1'], p['pred_b1'] = _init_linear(keys[12], 2 * d, d)
    p['pred_w2'], p['pred_b2'] = _init_linear(keys[13], d, n_tasks)
    return p


# -------------------------------- forward pass -------------------------------

def mpnn_forward(params, node_feats, edge_feats, src, dst, graph_ids, num_graphs,
                 d=64, num_step_message_passing=6, num_step_set2set=6,
                 num_layer_set2set=3, n_tasks=2, e_tile=32):
    v, node_in = node_feats.shape
    e, edge_in = edge_feats.shape
    v_pad = _round_up(v, 8)
    e_pad = _round_up(e, e_tile)

    # pad nodes/edges; padded edges are masked out of the one-hot matrices so they
    # contribute nothing; padded nodes belong to no graph so they never reach the output.
    nf = jnp.pad(node_feats, ((0, v_pad - v), (0, 0)))
    ef = jnp.pad(edge_feats, ((0, e_pad - e), (0, 0)))
    src_p = jnp.pad(src, (0, e_pad - e))
    dst_p = jnp.pad(dst, (0, e_pad - e))
    valid = (jnp.arange(e_pad) < e).astype(F32)[:, None]
    gather_oh = (jax.nn.one_hot(src_p, v_pad, dtype=F32) * valid).astype(BF16)  # (Ep, Vp)
    dst_oh = (jax.nn.one_hot(dst_p, v_pad, dtype=F32) * valid).astype(BF16)     # (Ep, Vp)
    member = jnp.pad(jax.nn.one_hot(graph_ids, num_graphs, dtype=F32).T,
                     ((0, 0), (0, v_pad - v)))                                   # (B, Vp)

    # per-edge NNConv weights (edge network), tiled over E, stored bf16
    w_e_flat = edge_network(ef, params['en_w1'], params['en_b1'].reshape(1, -1),
                            params['en_w2'], params['en_b2'].reshape(1, -1),
                            e_tile=e_tile)                                       # (Ep, D*D)
    w_e = w_e_flat.reshape(e_pad, d, d)

    # fused node projection + message passing + Set2Set readout + prediction head
    out = mp_s2s_predict(nf, params, gather_oh, dst_oh, w_e, member,
                         num_mp_steps=num_step_message_passing,
                         num_s2s_steps=num_step_set2set,
                         n_lstm_layers=num_layer_set2set,
                         n_tasks=n_tasks, e_tile=e_tile)                         # (B, n_tasks)
    return out


# ------------------------------------ main -----------------------------------

if __name__ == "__main__":
    key = jax.random.PRNGKey(0)
    node_in, edge_in = 16, 8
    d, n_tasks = 64, 2

    # two small graphs: graph 0 = 7-node path (nodes 0..6), graph 1 = 5-node path (7..11),
    # both with bidirected edges -> V = 12, E = 20 (padded to 32, one edge tile of 32).
    graph_ids = jnp.array([0] * 7 + [1] * 5, dtype=jnp.int32)
    und = [(i, i + 1) for i in range(6)] + [(i, i + 1) for i in range(7, 11)]
    src_list, dst_list = [], []
    for a, b in und:
        src_list += [a, b]
        dst_list += [b, a]
    src = jnp.array(src_list, dtype=jnp.int32)
    dst = jnp.array(dst_list, dtype=jnp.int32)
    num_graphs = 2
    v = graph_ids.shape[0]
    e = src.shape[0]

    k1, k2, k3 = jax.random.split(key, 3)
    node_feats = jax.random.normal(k1, (v, node_in), F32)
    edge_feats = jax.random.normal(k2, (e, edge_in), F32)
    params = init_params(k3, node_in, edge_in, d=d, n_tasks=n_tasks)

    out = mpnn_forward(params, node_feats, edge_feats, src, dst, graph_ids,
                       num_graphs, d=d, n_tasks=n_tasks)
    jax.block_until_ready(out)
    assert out.shape == (num_graphs, n_tasks) and out.dtype == jnp.float32
    print("KERNEL_OK")
</pallas_src>

<mosaic_0001>
module attributes {stable_mosaic.version = 11 : i64} {
  func.func @_edge_net_kernel(%arg0: i32, %arg1: memref<32x8xf32, #tpu.memory_space<vmem>>, %arg2: memref<8x128xf32, #tpu.memory_space<vmem>>, %arg3: memref<1x128xf32, #tpu.memory_space<vmem>>, %arg4: memref<128x4096xf32, #tpu.memory_space<vmem>>, %arg5: memref<1x4096xf32, #tpu.memory_space<vmem>>, %arg6: memref<32x4096xbf16, #tpu.memory_space<vmem>>) attributes {dimension_semantics = [#tpu.dimension_semantics<parallel>], iteration_bounds = array<i64: 1>, scalar_prefetch = 0 : i64, scratch_operands = 0 : i64, tpu.core_type = #tpu.core_type<tc>, window_params = [{transform_indices = @transform_0, window_bounds = array<i64: 32, 8>}, {pipeline_mode = #tpu.pipeline_mode<synchronous>, transform_indices = @transform_1, window_bounds = array<i64: 8, 128>}, {pipeline_mode = #tpu.pipeline_mode<synchronous>, transform_indices = @transform_2, window_bounds = array<i64: 1, 128>}, {pipeline_mode = #tpu.pipeline_mode<synchronous>, transform_indices = @transform_3, window_bounds = array<i64: 128, 4096>}, {pipeline_mode = #tpu.pipeline_mode<synchronous>, transform_indices = @transform_4, window_bounds = array<i64: 1, 4096>}, {transform_indices = @transform_5, window_bounds = array<i64: 32, 4096>}]} {
    %c0 = arith.constant 0 : index
    %c0_0 = arith.constant 0 : index
    %0 = vector.load %arg1[%c0, %c0_0] : memref<32x8xf32, #tpu.memory_space<vmem>>, vector<32x8xf32>
    %c0_1 = arith.constant 0 : index
    %c0_2 = arith.constant 0 : index
    %1 = vector.load %arg2[%c0_1, %c0_2] : memref<8x128xf32, #tpu.memory_space<vmem>>, vector<8x128xf32>
    %cst = arith.constant dense<0.000000e+00> : vector<32x128xf32>
    %2 = tpu.matmul %0, %1, %cst {dimension_numbers = #tpu.dot_dimension_numbers<[1], [0], [0], [1], [0, 0, 1, 1], [], []>} : vector<32x8xf32>, vector<8x128xf32>, vector<32x128xf32> -> vector<32x128xf32>
    %c0_3 = arith.constant 0 : index
    %c0_4 = arith.constant 0 : index
    %3 = vector.load %arg3[%c0_3, %c0_4] : memref<1x128xf32, #tpu.memory_space<vmem>>, vector<1x128xf32>
    %4 = vector.broadcast %3 : vector<1x128xf32> to vector<32x128xf32>
    %5 = arith.addf %2, %4 : vector<32x128xf32>
    %cst_5 = arith.constant 0.000000e+00 : f32
    %6 = vector.broadcast %cst_5 : f32 to vector<32x128xf32>
    %7 = arith.maximumf %5, %6 : vector<32x128xf32>
    %c0_6 = arith.constant 0 : index
    %c0_7 = arith.constant 0 : index
    %8 = vector.load %arg4[%c0_6, %c0_7] : memref<128x4096xf32, #tpu.memory_space<vmem>>, vector<128x4096xf32>
    %cst_8 = arith.constant dense<0.000000e+00> : vector<32x4096xf32>
    %9 = tpu.matmul %7, %8, %cst_8 {dimension_numbers = #tpu.dot_dimension_numbers<[1], [0], [0], [1], [0, 0, 1, 1], [], []>} : vector<32x128xf32>, vector<128x4096xf32>, vector<32x4096xf32> -> vector<32x4096xf32>
    %c0_9 = arith.constant 0 : index
    %c0_10 = arith.constant 0 : index
    %10 = vector.load %arg5[%c0_9, %c0_10] : memref<1x4096xf32, #tpu.memory_space<vmem>>, vector<1x4096xf32>
    %11 = vector.broadcast %10 : vector<1x4096xf32> to vector<32x4096xf32>
    %12 = arith.addf %9, %11 : vector<32x4096xf32>
    %13 = arith.truncf %12 : vector<32x4096xf32> to vector<32x4096xbf16>
    %c0_11 = arith.constant 0 : index
    %c0_12 = arith.constant 0 : index
    %14 = vector.load %arg6[%c0_11, %c0_12] : memref<32x4096xbf16, #tpu.memory_space<vmem>>, vector<32x4096xbf16>
    tpu.vector_store %arg6[%c0_11, %c0_12], %13 {strides = array<i32>} : memref<32x4096xbf16, #tpu.memory_space<vmem>>, vector<32x4096xbf16>,
    return
  }
  func.func @transform_0(%arg0: i32) -> (i32, i32) {
    %c0_i32 = arith.constant 0 : i32
    %c0_i32_0 = arith.constant 0 : i32
    return %arg0, %c0_i32 : i32, i32
  }
  func.func @transform_1(%arg0: i32) -> (i32, i32) {
    %c0_i32 = arith.constant 0 : i32
    %c0_i32_0 = arith.constant 0 : i32
    %c0_i32_1 = arith.constant 0 : i32
    return %c0_i32, %c0_i32_0 : i32, i32
  }
  func.func @transform_2(%arg0: i32) -> (i32, i32) {
    %c0_i32 = arith.constant 0 : i32
    %c0_i32_0 = arith.constant 0 : i32
    %c0_i32_1 = arith.constant 0 : i32
    return %c0_i32, %c0_i32_0 : i32, i32
  }
  func.func @transform_3(%arg0: i32) -> (i32, i32) {
    %c0_i32 = arith.constant 0 : i32
    %c0_i32_0 = arith.constant 0 : i32
    %c0_i32_1 = arith.constant 0 : i32
    return %c0_i32, %c0_i32_0 : i32, i32
  }
  func.func @transform_4(%arg0: i32) -> (i32, i32) {
    %c0_i32 = arith.constant 0 : i32
    %c0_i32_0 = arith.constant 0 : i32
    %c0_i32_1 = arith.constant 0 : i32
    return %c0_i32, %c0_i32_0 : i32, i32
  }
  func.func @transform_5(%arg0: i32) -> (i32, i32) {
    %c0_i32 = arith.constant 0 : i32
    %c0_i32_0 = arith.constant 0 : i32
    return %arg0, %c0_i32 : i32, i32
  }
}

</mosaic_0001>

<bundles_post_ra>
// kernel: tpu_custom_call.1
= control target key start
LH: loop header
LB: loop body
LE: loop exit
PB: predicated region body
PF: predicated region fallthrough
CT: control target
= control target key end

     0   :  { %10 = vsyncpa [#allocation3], 0  ;;  %s3885_s0 = inlined_call_operand.vmem [shape: f32[32,8], index: 0, kind: input, shape index: {}]   ;;  %s3886_s1 = inlined_call_operand.hbm [shape: f32[8,128], index: 1, kind: input, shape index: {}]   ;;  %s3887_s2 = inlined_call_operand.hbm [shape: f32[1,128], index: 2, kind: input, shape index: {}]   ;;  %s3888_s3 = inlined_call_operand.hbm [shape: f32[128,4096], index: 3, kind: input, shape index: {}]   ;;  %s3889_s4 = inlined_call_operand.hbm [shape: f32[1,4096], index: 4, kind: input, shape index: {}]   ;;  %s3890_s5 = inlined_call_operand.hbm [shape: bf16[32,4096], index: 5, kind: output, shape index: {}]  }
   0x1   :  { %11 = vsyncpa [#allocation6], 0 }
   0x2   :  { %12 = vsyncpa [#allocation9], 0 }
   0x3   :  { %13 = vsyncpa [#allocation4], 0  ;;  %s3541_s18 = smov [#allocation5]   ;;  %s3542_s20 = smov [#allocation2]  }
   0x4   :  { %s32_s19 = sshll.u32 %s3541_s18, 4  ;;  %s22_s21 = sshll.u32 %s3542_s20, 4  ;;  %s33_s19 = int_to_ptr.vmem [resolvable:$true] %s32_s19  ;;  %s23_s21 = int_to_ptr.vmem [resolvable:$true] %s22_s21 }
   0x5   :  { %s3423_s24 = scalar_lea.hbm %s3887_s2, 16 }
   0x6   :  { %p3424_p0 = scmp.ne.s32.totalorder %s3887_s2, %s3423_s24  ;;  %p3427_p1 = scmp.lt.u32.totalorder %s3423_s24, %s3887_s2 }
   0x8   :  { %p3429_p2 = pnand %p3427_p1, %p3424_p0 }
   0xa   :  { %3432 = shalt.err (!%p3429_p2)
}
   0xb   :  { %s3433_s29 = scalar_lea.vmem %s33_s19, 16  ;;  %s3437_s30 = scalar_lea.vmem %s33_s19, 32 }
   0xc   :  { %p3434_p3 = scmp.ne.s32.totalorder %s33_s19, %s3433_s29  ;;  %p3438_p4 = scmp.lt.s32.totalorder %s33_s19, %s33_s19 }
   0xd   :  { %p3439_p5 = scmp.lt.s32.totalorder %s3437_s30, %s3433_s29 }
   0xf   :  { %p3440_p6 = por %p3439_p5, %p3438_p4 }
  0x11   :  { %p3441_p7 = pnand %p3440_p6, %p3434_p3 }
  0x13   :  { %3444 = shalt.err (!%p3441_p7)
}
  0x14   :  { %35 = dma.hbm_to_vmem [thread:$0]  %s3887_s2, 16, %s33_s19, [#allocation6]  }
  0x15   :  { %s3445_s10 = scalar_lea.hbm %s3886_s1, 128 }
  0x16   :  { %p3446_p8 = scmp.ne.s32.totalorder %s3886_s1, %s3445_s10  ;;  %p3449_p9 = scmp.lt.u32.totalorder %s3445_s10, %s3886_s1 }
  0x18   :  { %p3451_p10 = pnand %p3449_p9, %p3446_p8 }
  0x1a   :  { %3454 = shalt.err (!%p3451_p10)
}
  0x1b   :  { %s3455_s15 = scalar_lea.vmem %s23_s21, 128  ;;  %p3460_p12 = scmp.lt.s32.totalorder %s23_s21, %s23_s21 }
  0x1c   :  { %p3456_p11 = scmp.ne.s32.totalorder %s23_s21, %s3455_s15  ;;  %p3461_p13 = scmp.lt.s32.totalorder %s3455_s15, %s3455_s15 }
  0x1e   :  { %p3462_p0 = por %p3461_p13, %p3460_p12 }
  0x20   :  { %p3463_p1 = pnand %p3462_p0, %p3456_p11 }
  0x22   :  { %3466 = shalt.err (!%p3463_p1)
}
  0x23   :  { %25 = dma.hbm_to_vmem [thread:$0]  %s3886_s1, 128, %s23_s21, [#allocation3]  }
  0x24   :  { %s3543_s17 = smov [#allocation7]   ;;  %s3467_s22 = scalar_lea.hbm %s3888_s3, 65536 }
  0x25   :  { %s41_s18 = sshll.u32 %s3543_s17, 4  ;;  %p3468_p2 = scmp.ne.s32.totalorder %s3888_s3, %s3467_s22  ;;  %s42_s18 = int_to_ptr.vmem [resolvable:$true] %s41_s18 }
  0x26   :  { %p3471_p3 = scmp.lt.u32.totalorder %s3467_s22, %s3888_s3 }
  0x28   :  { %p3473_p4 = pnand %p3471_p3, %p3468_p2 }
  0x2a   :  { %3476 = shalt.err (!%p3473_p4)
}
  0x2b   :  { %s3477_s27 = scalar_lea.vmem %s42_s18, 65536  ;;  %p3482_p6 = scmp.lt.s32.totalorder %s42_s18, %s42_s18 }
  0x2c   :  { %p3478_p5 = scmp.ne.s32.totalorder %s42_s18, %s3477_s27  ;;  %p3483_p7 = scmp.lt.s32.totalorder %s3477_s27, %s3477_s27 }
  0x2e   :  { %p3484_p8 = por %p3483_p7, %p3482_p6 }
  0x30   :  { %p3485_p9 = pnand %p3484_p8, %p3478_p5 }
  0x32   :  { %3488 = shalt.err (!%p3485_p9)
}
  0x33   :  { %s3544_s1 = smov 4096   ;;  %s3545_s21 = smov 256  }
  0x34   :  { %47 = dma.hbm_to_vmem [thread:$0]  %s3888_s3, 65536, %s42_s18, [#allocation6], %s3544_s1, %s3544_s1, %s3545_s21  }
  0x35   :  { %s3546_s30 = smov [#allocation8]   ;;  %s3489_s9 = scalar_lea.hbm %s3889_s4, 512 }
  0x36   :  { %s54_s6 = sshll.u32 %s3546_s30, 4  ;;  %p3490_p10 = scmp.ne.s32.totalorder %s3889_s4, %s3489_s9  ;;  %s55_s6 = int_to_ptr.vmem [resolvable:$true] %s54_s6 }
  0x37   :  { %p3493_p11 = scmp.lt.u32.totalorder %s3489_s9, %s3889_s4 }
  0x39   :  { %p3495_p12 = pnand %p3493_p11, %p3490_p10 }
  0x3b   :  { %3498 = shalt.err (!%p3495_p12)
}
  0x3c   :  { %s3499_s14 = scalar_lea.vmem %s55_s6, 512  ;;  %p3504_p0 = scmp.lt.s32.totalorder %s55_s6, %s55_s6 }
  0x3d   :  { %p3500_p13 = scmp.ne.s32.totalorder %s55_s6, %s3499_s14  ;;  %p3505_p1 = scmp.lt.s32.totalorder %s3499_s14, %s3499_s14 }
  0x3f   :  { %p3506_p2 = por %p3505_p1, %p3504_p0 }
  0x41   :  { %p3507_p3 = pnand %p3506_p2, %p3500_p13 }
  0x43   :  { %3510 = shalt.err (!%p3507_p3)
}
  0x44   :  { %57 = dma.hbm_to_vmem [thread:$0]  %s3889_s4, 512, %s55_s6, [#allocation9]  }
  0x45   :  { %3533 = dma.done.wait [#allocation3], 128  }
  0x46   :  { %3534 = vsyncadd [#allocation3], 4294967168 }
  0x47   :  { %3535 = dma.done.wait [#allocation6], 65552  }
  0x48   :  { %3536 = vsyncadd [#allocation6], 4294901744 }
  0x49   :  { %3537 = dma.done.wait [#allocation9], 512  }
  0x4a   :  { %3538 = vsyncadd [#allocation9], 4294966784  ;;  %vm82_vm0 = vcmask 64512   ;;  %v74_v0 = vld [vmem:[#allocation2] sm:$0xff]  ;;  %v71_v2 = vld [vmem:[%s3885_s0 + $0x8] sm:$0xff] }
  0x4b   :  { %v70_v1 = vld [vmem:[%s3885_s0] sm:$0xff]  ;;  %2893 = vmatprep.subr.mxu0 %v74_v0  ;;  %v72_v3 = vld [vmem:[%s3885_s0 + $0x10] sm:$0xff]  ;;  %v73_v5 = vld [vmem:[%s3885_s0 + $0x18] sm:$0xff]  ;;  %s3548_s0 = smov [#allocation10]  }
  0x4c   :  { %2895 = vmatprep.mubr.msk.f32.mxu0 %vm82_vm0, %v70_v1  ;;  %v185_v4 = vld [vmem:[#allocation7 + $0x8] sm:$0xff]  ;;  %2894 = vmatpush3.msra.mxu0 %v74_v0  ;;  %v187_v7 = vld [vmem:[#allocation7 + $0x18] sm:$0xff]  ;;  %v184_v11 = vld [vmem:[#allocation7] sm:$0xff]  ;;  %s2741_s23 = sshll.u32 %s3548_s0, 4  ;;  %s2742_s23 = int_to_ptr.vmem [resolvable:$true] %s2741_s23 }
  0x4d   :  { %v217_v6 = vld [vmem:[#allocation7 + $0x108] sm:$0xff]  ;;  %v219_v8 = vld [vmem:[#allocation7 + $0x118] sm:$0xff]  ;;  %2896 = vmatmul.mubr.msk.f32.vlgmr.msra.gmra.mrb[0].mxu0 %vm82_vm0, %v71_v2  ;;  %v216_v12 = vld [vmem:[#allocation7 + $0x100] sm:$0xff]  ;;  %s3511_s24 = scalar_lea.vmem %s2742_s23, 8192  ;;  %p3516_p5 = scmp.lt.s32.totalorder %s2742_s23, %s2742_s23 }
  0x4e   :  { %v2901_v9 = vpack.c.bf16 %v217_v6, %v185_v4  ;;  %v2933_v10 = vpack.c.bf16 %v219_v8, %v187_v7  ;;  %v186_v13 = vld [vmem:[#allocation7 + $0x10] sm:$0xff]  ;;  %2898 = vmatprep.mubr.msk.f32.mxu0 %vm82_vm0, %v72_v3  ;;  %v2903_v14 = vpack.c.bf16 %v216_v12, %v184_v11  ;;  %v249_v16 = vld [vmem:[#allocation7 + $0x208] sm:$0xff]  ;;  %v251_v20 = vld [vmem:[#allocation7 + $0x218] sm:$0xff]  ;;  %p3512_p4 = scmp.ne.s32.totalorder %s2742_s23, %s3511_s24  ;;  %p3517_p6 = scmp.lt.s32.totalorder %s3511_s24, %s3511_s24 }
  0x4f   :  { %v218_v15 = vld [vmem:[#allocation7 + $0x110] sm:$0xff]  ;;  %v281_v17 = vld [vmem:[#allocation7 + $0x308] sm:$0xff]  ;;  %v283_v21 = vld [vmem:[#allocation7 + $0x318] sm:$0xff] }
  0x50   :  { %2902 = vmatprep.subr.bf16.mxu1 %v2901_v9  ;;  %2934 = vmatprep.subr.bf16.mxu0 %v2933_v10  ;;  %v2935_v18 = vpack.c.bf16 %v218_v15, %v186_v13  ;;  %v2905_v19 = vpack.c.bf16 %v281_v17, %v249_v16  ;;  %v248_v22 = vld [vmem:[#allocation7 + $0x200] sm:$0xff]  ;;  %v2937_v23 = vpack.c.bf16 %v283_v21, %v251_v20  ;;  %v250_v25 = vld [vmem:[#allocation7 + $0x210] sm:$0xff]  ;;  %v313_v28 = vld [vmem:[#allocation7 + $0x408] sm:$0xff]  ;;  %p3518_p7 = por %p3517_p6, %p3516_p5 }
  0x51   :  { %2904 = vmatpush1.bf16.msra.mxu1 %v2903_v14  ;;  %v280_v24 = vld [vmem:[#allocation7 + $0x300] sm:$0xff]  ;;  %v282_v26 = vld [vmem:[#allocation7 + $0x310] sm:$0xff]  ;;  %2899 = vmatmul.mubr.msk.f32.gmra.mrb[2].mxu0 %vm82_vm0, %v73_v5  ;;  %v345_v29 = vld [vmem:[#allocation7 + $0x508] sm:$0xff] }
  0x52   :  { %2906 = vmatprep.subr.bf16.mxu1 %v2905_v19  ;;  %v2907_v27 = vpack.c.bf16 %v280_v24, %v248_v22  ;;  %v315_v30 = vld [vmem:[#allocation7 + $0x418] sm:$0xff]  ;;  %2936 = vmatpush1.bf16.msra.mxu0 %v2935_v18  ;;  %v2939_v31 = vpack.c.bf16 %v282_v26, %v250_v25  ;;  %v2909_v32 = vpack.c.bf16 %v345_v29, %v313_v28  ;;  %v312_v34 = vld [vmem:[#allocation7 + $0x400] sm:$0xff]  ;;  %v314_v37 = vld [vmem:[#allocation7 + $0x410] sm:$0xff]  ;;  %p3519_p8 = pnand %p3518_p7, %p3512_p4 }
  0x53   :  { %v347_v33 = vld [vmem:[#allocation7 + $0x518] sm:$0xff]  ;;  %v344_v35 = vld [vmem:[#allocation7 + $0x500] sm:$0xff]  ;;  %2938 = vmatprep.subr.bf16.mxu0 %v2937_v23  ;;  %v346_v38 = vld [vmem:[#allocation7 + $0x510] sm:$0xff] }
  0x54   :  { %v2941_v36 = vpack.c.bf16 %v347_v33, %v315_v30  ;;  %v377_v39 = vld [vmem:[#allocation7 + $0x608] sm:$0xff]  ;;  %v2911_v40 = vpack.c.bf16 %v344_v35, %v312_v34  ;;  %v379_v42 = vld [vmem:[#allocation7 + $0x618] sm:$0xff]  ;;  %v376_v45 = vld [vmem:[#allocation7 + $0x600] sm:$0xff]  ;;  %v2943_v47 = vpack.c.bf16 %v346_v38, %v314_v37 }
  0x55   :  { %2908 = vmatpush1.bf16.msra.mxu1 %v2907_v27  ;;  %v409_v41 = vld [vmem:[#allocation7 + $0x708] sm:$0xff]  ;;  %v411_v43 = vld [vmem:[#allocation7 + $0x718] sm:$0xff]  ;;  %v408_v46 = vld [vmem:[#allocation7 + $0x700] sm:$0xff] }
  0x56   :  { %2910 = vmatprep.subr.bf16.mxu1 %v2909_v32  ;;  %v2913_v44 = vpack.c.bf16 %v409_v41, %v377_v39  ;;  %2940 = vmatpush1.bf16.msra.mxu0 %v2939_v31  ;;  %v441_v48 = vld [vmem:[#allocation7 + $0x808] sm:$0xff]  ;;  %v2945_v50 = vpack.c.bf16 %v411_v43, %v379_v42  ;;  %v378_v51 = vld [vmem:[#allocation7 + $0x610] sm:$0xff]  ;;  %v2915_v53 = vpack.c.bf16 %v408_v46, %v376_v45  ;;  %v443_v54 = vld [vmem:[#allocation7 + $0x818] sm:$0xff]  ;;  %v3547_v43 = vmov 0.0  }
  0x57   :  { %v473_v49 = vld [vmem:[#allocation7 + $0x908] sm:$0xff]  ;;  %2942 = vmatprep.subr.bf16.mxu0 %v2941_v36  ;;  %v410_v52 = vld [vmem:[#allocation7 + $0x710] sm:$0xff]  ;;  %v475_v55 = vld [vmem:[#allocation7 + $0x918] sm:$0xff]  ;;  %928 = vmatprep.mubr.f32.mxu1 %v3547_v43 }
  0x58   :  { %v2917_v56 = vpack.c.bf16 %v473_v49, %v441_v48  ;;  %v440_v57 = vld [vmem:[#allocation7 + $0x800] sm:$0xff]  ;;  %v2947_v59 = vpack.c.bf16 %v410_v52, %v378_v51  ;;  %v505_v60 = vld [vmem:[#allocation7 + $0xa08] sm:$0xff]  ;;  %v2949_v62 = vpack.c.bf16 %v475_v55, %v443_v54  ;;  %v442_v63 = vld [vmem:[#allocation7 + $0x810] sm:$0xff]  ;;  %1017 = vmatprep.mubr.f32.mxu0 %v3547_v43 }
  0x59   :  { %2912 = vmatpush1.bf16.msra.mxu1 %v2911_v40  ;;  %v472_v58 = vld [vmem:[#allocation7 + $0x900] sm:$0xff]  ;;  %v537_v61 = vld [vmem:[#allocation7 + $0xb08] sm:$0xff]  ;;  %v474_v0 = vld [vmem:[#allocation7 + $0x910] sm:$0xff] }
  0x5a   :  { %2914 = vmatprep.subr.bf16.mxu1 %v2913_v44  ;;  %2944 = vmatpush1.bf16.msra.mxu0 %v2943_v47  ;;  %v2919_v1 = vpack.c.bf16 %v472_v58, %v440_v57  ;;  %v507_v2 = vld [vmem:[#allocation7 + $0xa18] sm:$0xff]  ;;  %v2921_v4 = vpack.c.bf16 %v537_v61, %v505_v60  ;;  %v504_v5 = vld [vmem:[#allocation7 + $0xa00] sm:$0xff]  ;;  %v2951_v7 = vpack.c.bf16 %v474_v0, %v442_v63  ;;  %v569_v8 = vld [vmem:[#allocation7 + $0xc08] sm:$0xff] }
  0x5b   :  { %2946 = vmatprep.subr.bf16.mxu0 %v2945_v50  ;;  %v539_v3 = vld [vmem:[#allocation7 + $0xb18] sm:$0xff]  ;;  %v536_v6 = vld [vmem:[#allocation7 + $0xb00] sm:$0xff]  ;;  %v601_v9 = vld [vmem:[#allocation7 + $0xd08] sm:$0xff] }
  0x5c   :  { %v2953_v10 = vpack.c.bf16 %v539_v3, %v507_v2  ;;  %v506_v11 = vld [vmem:[#allocation7 + $0xa10] sm:$0xff]  ;;  %v2923_v13 = vpack.c.bf16 %v536_v6, %v504_v5  ;;  %v571_v14 = vld [vmem:[#allocation7 + $0xc18] sm:$0xff]  ;;  %v2925_v16 = vpack.c.bf16 %v601_v9, %v569_v8  ;;  %v568_v17 = vld [vmem:[#allocation7 + $0xc00] sm:$0xff] }
  0x5d   :  { %2916 = vmatpush1.bf16.msra.mxu1 %v2915_v53  ;;  %v538_v12 = vld [vmem:[#allocation7 + $0xb10] sm:$0xff]  ;;  %v603_v15 = vld [vmem:[#allocation7 + $0xd18] sm:$0xff]  ;;  %v600_v18 = vld [vmem:[#allocation7 + $0xd00] sm:$0xff] }
  0x5e   :  { %2918 = vmatprep.subr.bf16.mxu1 %v2917_v56  ;;  %2948 = vmatpush1.bf16.msra.mxu0 %v2947_v59  ;;  %v2955_v19 = vpack.c.bf16 %v538_v12, %v506_v11  ;;  %v2957_v20 = vpack.c.bf16 %v603_v15, %v571_v14  ;;  %v570_v21 = vld [vmem:[#allocation7 + $0xc10] sm:$0xff]  ;;  %v2927_v23 = vpack.c.bf16 %v600_v18, %v568_v17  ;;  %v633_v25 = vld [vmem:[#allocation7 + $0xe08] sm:$0xff]  ;;  %v635_v27 = vld [vmem:[#allocation7 + $0xe18] sm:$0xff] }
  0x5f   :  { %2950 = vmatprep.subr.bf16.mxu0 %v2949_v62  ;;  %v602_v22 = vld [vmem:[#allocation7 + $0xd10] sm:$0xff]  ;;  %v665_v26 = vld [vmem:[#allocation7 + $0xf08] sm:$0xff]  ;;  %v667_v29 = vld [vmem:[#allocation7 + $0xf18] sm:$0xff] }
  0x60   :  { %v2959_v24 = vpack.c.bf16 %v602_v22, %v570_v21  ;;  %v2929_v28 = vpack.c.bf16 %v665_v26, %v633_v25  ;;  %v632_v30 = vld [vmem:[#allocation7 + $0xe00] sm:$0xff]  ;;  %v2961_v32 = vpack.c.bf16 %v667_v29, %v635_v27  ;;  %v634_v34 = vld [vmem:[#allocation7 + $0xe10] sm:$0xff]  ;;  %v189_v37 = vld [vmem:[#allocation7 + $0x28] sm:$0xff] }
  0x61   :  { %2920 = vmatpush1.bf16.msra.mxu1 %v2919_v1  ;;  %v664_v31 = vld [vmem:[#allocation7 + $0xf00] sm:$0xff]  ;;  %v666_v35 = vld [vmem:[#allocation7 + $0xf10] sm:$0xff]  ;;  %v221_v38 = vld [vmem:[#allocation7 + $0x128] sm:$0xff] }
  0x62   :  { %2922 = vmatprep.subr.bf16.mxu1 %v2921_v4  ;;  %2952 = vmatpush1.bf16.msra.mxu0 %v2951_v7  ;;  %v2931_v33 = vpack.c.bf16 %v664_v31, %v632_v30  ;;  %v2963_v36 = vpack.c.bf16 %v666_v35, %v634_v34  ;;  %v191_v39 = vld [vmem:[#allocation7 + $0x38] sm:$0xff]  ;;  %v2965_v40 = vpack.c.bf16 %v221_v38, %v189_v37  ;;  %v188_v45 = vld [vmem:[#allocation7 + $0x20] sm:$0xff]  ;;  %v190_v48 = vld [vmem:[#allocation7 + $0x30] sm:$0xff] }
  0x63   :  { %2954 = vmatprep.subr.bf16.mxu0 %v2953_v10  ;;  %v223_v41 = vld [vmem:[#allocation7 + $0x138] sm:$0xff]  ;;  %v220_v47 = vld [vmem:[#allocation7 + $0x120] sm:$0xff]  ;;  %v222_v49 = vld [vmem:[#allocation7 + $0x130] sm:$0xff] }
  0x64   :  { %v2997_v42 = vpack.c.bf16 %v223_v41, %v191_v39  ;;  %v2755_v44 = vld [vmem:[#allocation5] ss:$0 sm:$0xff]  ;;  %v253_v51 = vld [vmem:[#allocation7 + $0x228] sm:$0xff]  ;;  %v2967_v56 = vpack.c.bf16 %v220_v47, %v188_v45  ;;  %v2999_v57 = vpack.c.bf16 %v222_v49, %v190_v48  ;;  %v252_v58 = vld [vmem:[#allocation7 + $0x220] sm:$0xff] }
  0x65   :  { %2924 = vmatpush1.bf16.msra.mxu1 %v2923_v13  ;;  %v285_v53 = vld [vmem:[#allocation7 + $0x328] sm:$0xff]  ;;  %v255_v54 = vld [vmem:[#allocation7 + $0x238] sm:$0xff]  ;;  %v284_v59 = vld [vmem:[#allocation7 + $0x320] sm:$0xff] }
  0x66   :  { %2926 = vmatprep.subr.bf16.mxu1 %v2925_v16  ;;  %2956 = vmatpush1.bf16.msra.mxu0 %v2955_v19  ;;  %v287_v55 = vld [vmem:[#allocation7 + $0x338] sm:$0xff]  ;;  %v254_v62 = vld [vmem:[#allocation7 + $0x230] sm:$0xff]  ;;  %v317_v0 = vld [vmem:[#allocation7 + $0x428] sm:$0xff]  ;;  %v2969_v2 = vpack.c.bf16 %v285_v53, %v253_v51  ;;  %v2971_v9 = vpack.c.bf16 %v284_v59, %v252_v58 }
  0x67   :  { %2958 = vmatprep.subr.bf16.mxu0 %v2957_v20  ;;  %v286_v63 = vld [vmem:[#allocation7 + $0x330] sm:$0xff]  ;;  %v3001_v3 = vpack.c.bf16 %v287_v55, %v255_v54  ;;  %v349_v4 = vld [vmem:[#allocation7 + $0x528] sm:$0xff]  ;;  %v319_v5 = vld [vmem:[#allocation7 + $0x438] sm:$0xff] }
  0x68   :  { %v351_v6 = vld [vmem:[#allocation7 + $0x538] sm:$0xff]  ;;  %v3003_v10 = vpack.c.bf16 %v286_v63, %v254_v62  ;;  %v316_v11 = vld [vmem:[#allocation7 + $0x420] sm:$0xff]  ;;  %v2973_v14 = vpack.c.bf16 %v349_v4, %v317_v0  ;;  %v318_v16 = vld [vmem:[#allocation7 + $0x430] sm:$0xff] }
  0x69   :  { %2928 = vmatpush1.bf16.msra.mxu1 %v2927_v23  ;;  %v348_v12 = vld [vmem:[#allocation7 + $0x520] sm:$0xff]  ;;  %v3005_v15 = vpack.c.bf16 %v351_v6, %v319_v5  ;;  %v350_v17 = vld [vmem:[#allocation7 + $0x530] sm:$0xff]  ;;  %v381_v18 = vld [vmem:[#allocation7 + $0x628] sm:$0xff] }
  0x6a   :  { %2960 = vmatpush1.bf16.msra.mxu0 %v2959_v24  ;;  %2930 = vmatprep.subr.bf16.mxu1 %v2929_v28  ;;  %v413_v19 = vld [vmem:[#allocation7 + $0x728] sm:$0xff]  ;;  %v383_v20 = vld [vmem:[#allocation7 + $0x638] sm:$0xff]  ;;  %v2975_v24 = vpack.c.bf16 %v348_v12, %v316_v11  ;;  %v3007_v25 = vpack.c.bf16 %v350_v17, %v318_v16  ;;  %v380_v26 = vld [vmem:[#allocation7 + $0x620] sm:$0xff] }
  0x6b   :  { %2962 = vmatprep.subr.bf16.mxu0 %v2961_v32  ;;  %v415_v21 = vld [vmem:[#allocation7 + $0x738] sm:$0xff]  ;;  %v412_v27 = vld [vmem:[#allocation7 + $0x720] sm:$0xff]  ;;  %v2977_v28 = vpack.c.bf16 %v413_v19, %v381_v18  ;;  %v382_v30 = vld [vmem:[#allocation7 + $0x630] sm:$0xff] }
  0x6c   :  { %v3009_v29 = vpack.c.bf16 %v415_v21, %v383_v20  ;;  %v414_v31 = vld [vmem:[#allocation7 + $0x730] sm:$0xff]  ;;  %v445_v32 = vld [vmem:[#allocation7 + $0x828] sm:$0xff]  ;;  %v447_v34 = vld [vmem:[#allocation7 + $0x838] sm:$0xff]  ;;  %v2979_v37 = vpack.c.bf16 %v412_v27, %v380_v26 }
  0x6d   :  { %2932 = vmatpush1.bf16.msra.mxu1 %v2931_v33  ;;  %v477_v33 = vld [vmem:[#allocation7 + $0x928] sm:$0xff]  ;;  %v479_v35 = vld [vmem:[#allocation7 + $0x938] sm:$0xff]  ;;  %v3011_v38 = vpack.c.bf16 %v414_v31, %v382_v30  ;;  %v444_v39 = vld [vmem:[#allocation7 + $0x820] sm:$0xff] }
  0x6e   :  { %2964 = vmatpush1.bf16.msra.mxu0 %v2963_v36  ;;  %2966 = vmatprep.subr.bf16.mxu1 %v2965_v40  ;;  %v476_v40 = vld [vmem:[#allocation7 + $0x920] sm:$0xff]  ;;  %v2981_v41 = vpack.c.bf16 %v477_v33, %v445_v32  ;;  %v478_v45 = vld [vmem:[#allocation7 + $0x930] sm:$0xff]  ;;  %v541_v47 = vld [vmem:[#allocation7 + $0xb28] sm:$0xff] }
  0x6f   :  { %2998 = vmatprep.subr.bf16.mxu0 %v2997_v42  ;;  %v3013_v42 = vpack.c.bf16 %v479_v35, %v447_v34  ;;  %v511_v48 = vld [vmem:[#allocation7 + $0xa38] sm:$0xff]  ;;  %v540_v53 = vld [vmem:[#allocation7 + $0xb20] sm:$0xff]  ;;  %v573_v58 = vld [vmem:[#allocation7 + $0xc28] sm:$0xff] }
  0x70   :  { %v543_v49 = vld [vmem:[#allocation7 + $0xb38] sm:$0xff]  ;;  %v605_v59 = vld [vmem:[#allocation7 + $0xd28] sm:$0xff]  ;;  %v574_v5 = vld [vmem:[#allocation7 + $0xc30] sm:$0xff] }
  0x71   :  { %v3017_v55 = vpack.c.bf16 %v543_v49, %v511_v48  ;;  %v607_v62 = vld [vmem:[#allocation7 + $0xd38] sm:$0xff]  ;;  %v606_v6 = vld [vmem:[#allocation7 + $0xd30] sm:$0xff]  ;;  %v193_v20 = vld [vmem:[#allocation7 + $0x48] sm:$0xff] }
  0x72   :  { %v3023_v12 = vpack.c.bf16 %v606_v6, %v574_v5  ;;  %v638_v18 = vld [vmem:[#allocation7 + $0xe30] sm:$0xff]  ;;  %v225_v21 = vld [vmem:[#allocation7 + $0x148] sm:$0xff]  ;;  %v192_v27 = vld [vmem:[#allocation7 + $0x40] sm:$0xff] }
  0x73   :  { %v670_v19 = vld [vmem:[#allocation7 + $0xf30] sm:$0xff]  ;;  %v224_v30 = vld [vmem:[#allocation7 + $0x140] sm:$0xff]  ;;  %v257_v33 = vld [vmem:[#allocation7 + $0x248] sm:$0xff] }
  0x74   :  { %v3027_v26 = vpack.c.bf16 %v670_v19, %v638_v18  ;;  %v194_v31 = vld [vmem:[#allocation7 + $0x50] sm:$0xff]  ;;  %v289_v34 = vld [vmem:[#allocation7 + $0x348] sm:$0xff]  ;;  %v259_v35 = vld [vmem:[#allocation7 + $0x258] sm:$0xff] }
  0x75   :  { %v226_v32 = vld [vmem:[#allocation7 + $0x150] sm:$0xff]  ;;  %v353_v48 = vld [vmem:[#allocation7 + $0x548] sm:$0xff]  ;;  %v323_v49 = vld [vmem:[#allocation7 + $0x458] sm:$0xff] }
  0x76   :  { %v418_v5 = vld [vmem:[#allocation7 + $0x750] sm:$0xff]  ;;  %v449_v6 = vld [vmem:[#allocation7 + $0x848] sm:$0xff] }
  0x77   :  { %v450_v19 = vld [vmem:[#allocation7 + $0x850] sm:$0xff] }
 0x120   :  { %v2897_v46 = vpop.f32.mrb[0].mxu0 }
 0x121   :  { %v161_v50 = vpop.f32.mrb[1].mxu0  ;;  %v167_v60 = vadd.f32 %v2897_v46, %v2755_v44  ;;  %v509_v46 = vld [vmem:[#allocation7 + $0xa28] sm:$0xff] }
 0x122   :  { %v162_v52 = vadd.f32 %v2755_v44, %v161_v50  ;;  %v2983_v50 = vpack.c.bf16 %v476_v40, %v444_v39  ;;  %v2985_v54 = vpack.c.bf16 %v541_v47, %v509_v46  ;;  %v3063_v39 = vpack.c.bf16 %v226_v32, %v194_v31  ;;  %v256_v40 = vld [vmem:[#allocation7 + $0x240] sm:$0xff]  ;;  %v321_v47 = vld [vmem:[#allocation7 + $0x448] sm:$0xff]  ;;  %v514_v32 = vld [vmem:[#allocation7 + $0xa50] sm:$0xff] }
 0x123   :  { %v3651_v13 = vmax.f32 %v167_v60, 0.0  ;;  %v575_v60 = vld [vmem:[#allocation7 + $0xc38] sm:$0xff] }
 0x124   :  { %v3647_v61 = vmax.f32 %v162_v52, 0.0  ;;  %v2900_v1 = vpop.f32.mrb[2].mxu0  ;;  %v508_v52 = vld [vmem:[#allocation7 + $0xa20] sm:$0xff]  ;;  %v3021_v4 = vpack.c.bf16 %v607_v62, %v575_v60  ;;  %v417_v60 = vld [vmem:[#allocation7 + $0x748] sm:$0xff]  ;;  %v387_v62 = vld [vmem:[#allocation7 + $0x658] sm:$0xff] }
 0x125   :  { %v171_v7 = vpop.f32.mrb[3].mxu0  ;;  %v177_v22 = vadd.f32 %v2900_v1, %v2755_v44  ;;  %v2987_v63 = vpack.c.bf16 %v540_v53, %v508_v52  ;;  %v572_v1 = vld [vmem:[#allocation7 + $0xc20] sm:$0xff] }
 0x126   :  { %929 = vmatmul.mubr.f32.vlgmr.msra.gmra.mrb[0].mxu1 %v3647_v61  ;;  %1018 = vmatmul.mubr.f32.vlgmr.msra.gmra.mrb[4].mxu0 %v3647_v61  ;;  %v172_v8 = vadd.f32 %v2755_v44, %v171_v7  ;;  %v446_v44 = vld [vmem:[#allocation7 + $0x830] sm:$0xff]  ;;  %v637_v7 = vld [vmem:[#allocation7 + $0xe28] sm:$0xff]  ;;  %v320_v53 = vld [vmem:[#allocation7 + $0x440] sm:$0xff] }
 0x127   :  { %2968 = vmatpush1.bf16.msra.mxu1 %v2967_v56  ;;  %3000 = vmatpush1.bf16.msra.mxu0 %v2999_v57  ;;  %v3661_v36 = vmax.f32 %v177_v22, 0.0  ;;  %v3015_v51 = vpack.c.bf16 %v478_v45, %v446_v44  ;;  %v510_v56 = vld [vmem:[#allocation7 + $0xa30] sm:$0xff]  ;;  %v195_v22 = vld [vmem:[#allocation7 + $0x58] sm:$0xff]  ;;  %v3033_v45 = vpack.c.bf16 %v289_v34, %v257_v33  ;;  %v577_v34 = vld [vmem:[#allocation7 + $0xc48] sm:$0xff] }
 0x128   :  { %934 = vmatprep.mubr.f32.mxu1 %v3547_v43  ;;  %1023 = vmatprep.mubr.f32.mxu0 %v3547_v43  ;;  %v3657_v23 = vmax.f32 %v172_v8, 0.0  ;;  %v542_v57 = vld [vmem:[#allocation7 + $0xb30] sm:$0xff]  ;;  %v669_v8 = vld [vmem:[#allocation7 + $0xf28] sm:$0xff] }
 0x129   :  { %2970 = vmatprep.subr.bf16.mxu1 %v2969_v2  ;;  %3002 = vmatprep.subr.bf16.mxu0 %v3001_v3  ;;  %v3019_v0 = vpack.c.bf16 %v542_v57, %v510_v56  ;;  %v604_v2 = vld [vmem:[#allocation7 + $0xd20] sm:$0xff]  ;;  %v2989_v3 = vpack.c.bf16 %v605_v59, %v573_v58  ;;  %v2993_v16 = vpack.c.bf16 %v669_v8, %v637_v7  ;;  %v290_v44 = vld [vmem:[#allocation7 + $0x350] sm:$0xff]  ;;  %v385_v59 = vld [vmem:[#allocation7 + $0x648] sm:$0xff] }
 0x12a   :  { %935 = vmatmul.mubr.f32.gmra.mrb[2].mxu1 %v3651_v13  ;;  %1024 = vmatmul.mubr.f32.gmra.mrb[6].mxu0 %v3651_v13  ;;  %v2991_v11 = vpack.c.bf16 %v604_v2, %v572_v1  ;;  %v354_v56 = vld [vmem:[#allocation7 + $0x550] sm:$0xff]  ;;  %v3037_v57 = vpack.c.bf16 %v353_v48, %v321_v47  ;;  %v384_v2 = vld [vmem:[#allocation7 + $0x640] sm:$0xff]  ;;  %v3041_v7 = vpack.c.bf16 %v417_v60, %v385_v59  ;;  %v641_v48 = vld [vmem:[#allocation7 + $0xe48] sm:$0xff] }
 0x12b   :  { %2972 = vmatpush1.bf16.msra.mxu1 %v2971_v9  ;;  %3004 = vmatpush1.bf16.msra.mxu0 %v3003_v10  ;;  %v639_v9 = vld [vmem:[#allocation7 + $0xe38] sm:$0xff]  ;;  %v546_v33 = vld [vmem:[#allocation7 + $0xb50] sm:$0xff]  ;;  %v197_v60 = vld [vmem:[#allocation7 + $0x68] sm:$0xff] }
 0x12c   :  { %2974 = vmatprep.subr.bf16.mxu1 %v2973_v14  ;;  %3006 = vmatprep.subr.bf16.mxu0 %v3005_v15  ;;  %v671_v10 = vld [vmem:[#allocation7 + $0xf38] sm:$0xff]  ;;  %v636_v14 = vld [vmem:[#allocation7 + $0xe20] sm:$0xff]  ;;  %v610_v47 = vld [vmem:[#allocation7 + $0xd50] sm:$0xff] }
 0x12d   :  { %940 = vmatprep.mubr.f32.mxu1 %v3547_v43  ;;  %1029 = vmatprep.mubr.f32.mxu0 %v3547_v43  ;;  %v668_v15 = vld [vmem:[#allocation7 + $0xf20] sm:$0xff]  ;;  %v3025_v17 = vpack.c.bf16 %v671_v10, %v639_v9  ;;  %v481_v9 = vld [vmem:[#allocation7 + $0x948] sm:$0xff]  ;;  %v451_v10 = vld [vmem:[#allocation7 + $0x858] sm:$0xff] }
 0x12e   :  { %941 = vmatmul.mubr.f32.gmra.mrb[4].mxu1 %v3657_v23  ;;  %1030 = vmatmul.mubr.f32.gmra.mrb[8].mxu0 %v3657_v23  ;;  %v674_v59 = vld [vmem:[#allocation7 + $0xf50] sm:$0xff] }
 0x12f   :  { %2976 = vmatpush1.bf16.msra.mxu1 %v2975_v24  ;;  %3008 = vmatpush1.bf16.msra.mxu0 %v3007_v25  ;;  %v227_v24 = vld [vmem:[#allocation7 + $0x158] sm:$0xff]  ;;  %v2995_v25 = vpack.c.bf16 %v668_v15, %v636_v14  ;;  %v448_v15 = vld [vmem:[#allocation7 + $0x840] sm:$0xff] }
 0x130   :  { %2978 = vmatprep.subr.bf16.mxu1 %v2977_v28  ;;  %3010 = vmatprep.subr.bf16.mxu0 %v3009_v29  ;;  %v3029_v28 = vpack.c.bf16 %v225_v21, %v193_v20  ;;  %v3061_v29 = vpack.c.bf16 %v227_v24, %v195_v22  ;;  %v482_v20 = vld [vmem:[#allocation7 + $0x950] sm:$0xff]  ;;  %v513_v21 = vld [vmem:[#allocation7 + $0xa48] sm:$0xff]  ;;  %v515_v24 = vld [vmem:[#allocation7 + $0xa58] sm:$0xff] }
 0x131   :  { %946 = vmatprep.mubr.f32.mxu1 %v3547_v43  ;;  %1035 = vmatprep.mubr.f32.mxu0 %v3547_v43  ;;  %v545_v22 = vld [vmem:[#allocation7 + $0xb48] sm:$0xff] }
 0x132   :  { %947 = vmatmul.mubr.f32.gmra.mrb[6].mxu1 %v3661_v36  ;;  %1036 = vmatmul.mubr.f32.gmra.mrb[10].mxu0 %v3661_v36 }
 0x133   :  { %2980 = vmatpush1.bf16.msra.mxu1 %v2979_v37  ;;  %3012 = vmatpush1.bf16.msra.mxu0 %v3011_v38  ;;  %v291_v37 = vld [vmem:[#allocation7 + $0x358] sm:$0xff]  ;;  %v3031_v38 = vpack.c.bf16 %v224_v30, %v192_v27  ;;  %v3079_v27 = vpack.c.bf16 %v482_v20, %v450_v19  ;;  %v3049_v30 = vpack.c.bf16 %v545_v22, %v513_v21  ;;  %v294_v19 = vld [vmem:[#allocation7 + $0x370] sm:$0xff]  ;;  %v325_v22 = vld [vmem:[#allocation7 + $0x468] sm:$0xff] }
 0x134   :  { %2982 = vmatprep.subr.bf16.mxu1 %v2981_v41  ;;  %3014 = vmatprep.subr.bf16.mxu0 %v3013_v42  ;;  %v288_v41 = vld [vmem:[#allocation7 + $0x340] sm:$0xff]  ;;  %v258_v42 = vld [vmem:[#allocation7 + $0x250] sm:$0xff]  ;;  %v3065_v46 = vpack.c.bf16 %v291_v37, %v259_v35  ;;  %v609_v35 = vld [vmem:[#allocation7 + $0xd48] sm:$0xff] }
 0x135   :  { %1106 = vmatprep.mubr.f32.mxu1 %v3547_v43  ;;  %1195 = vmatprep.mubr.f32.mxu0 %v3547_v43  ;;  %v3067_v52 = vpack.c.bf16 %v290_v44, %v258_v42  ;;  %v579_v37 = vld [vmem:[#allocation7 + $0xc58] sm:$0xff]  ;;  %v608_v42 = vld [vmem:[#allocation7 + $0xd40] sm:$0xff]  ;;  %v3053_v44 = vpack.c.bf16 %v609_v35, %v577_v34  ;;  %v389_v35 = vld [vmem:[#allocation7 + $0x668] sm:$0xff] }
 0x137   :  { %2984 = vmatpush1.bf16.msra.mxu1 %v2983_v50  ;;  %3016 = vmatpush1.bf16.msra.mxu0 %v3015_v51  ;;  %v355_v50 = vld [vmem:[#allocation7 + $0x558] sm:$0xff]  ;;  %v3035_v51 = vpack.c.bf16 %v288_v41, %v256_v40  ;;  %v3083_v40 = vpack.c.bf16 %v546_v33, %v514_v32  ;;  %v576_v41 = vld [vmem:[#allocation7 + $0xc40] sm:$0xff]  ;;  %v358_v32 = vld [vmem:[#allocation7 + $0x570] sm:$0xff] }
 0x138   :  { %2986 = vmatprep.subr.bf16.mxu1 %v2985_v54  ;;  %3018 = vmatprep.subr.bf16.mxu0 %v3017_v55  ;;  %v352_v54 = vld [vmem:[#allocation7 + $0x540] sm:$0xff]  ;;  %v322_v55 = vld [vmem:[#allocation7 + $0x450] sm:$0xff]  ;;  %v3069_v58 = vpack.c.bf16 %v355_v50, %v323_v49  ;;  %v673_v49 = vld [vmem:[#allocation7 + $0xf48] sm:$0xff] }
 0x139   :  { %v3071_v1 = vpack.c.bf16 %v354_v56, %v322_v55  ;;  %v643_v50 = vld [vmem:[#allocation7 + $0xe58] sm:$0xff]  ;;  %v672_v55 = vld [vmem:[#allocation7 + $0xf40] sm:$0xff]  ;;  %v3057_v56 = vpack.c.bf16 %v673_v49, %v641_v48 }
 0x13b   :  { %2988 = vmatpush1.bf16.msra.mxu1 %v2987_v63  ;;  %3020 = vmatpush1.bf16.msra.mxu0 %v3019_v0  ;;  %v419_v63 = vld [vmem:[#allocation7 + $0x758] sm:$0xff]  ;;  %v3039_v0 = vpack.c.bf16 %v352_v54, %v320_v53  ;;  %v640_v54 = vld [vmem:[#allocation7 + $0xe40] sm:$0xff] }
 0x13c   :  { %2990 = vmatprep.subr.bf16.mxu1 %v2989_v3  ;;  %3022 = vmatprep.subr.bf16.mxu0 %v3021_v4  ;;  %v416_v3 = vld [vmem:[#allocation7 + $0x740] sm:$0xff]  ;;  %v386_v4 = vld [vmem:[#allocation7 + $0x650] sm:$0xff]  ;;  %v3073_v8 = vpack.c.bf16 %v419_v63, %v387_v62  ;;  %v229_v62 = vld [vmem:[#allocation7 + $0x168] sm:$0xff] }
 0x13d   :  { %v3075_v14 = vpack.c.bf16 %v418_v5, %v386_v4  ;;  %v199_v63 = vld [vmem:[#allocation7 + $0x78] sm:$0xff]  ;;  %v3093_v4 = vpack.c.bf16 %v229_v62, %v197_v60  ;;  %v486_v60 = vld [vmem:[#allocation7 + $0x970] sm:$0xff]  ;;  %v517_v62 = vld [vmem:[#allocation7 + $0xa68] sm:$0xff] }
 0x13f   :  { %2992 = vmatpush1.bf16.msra.mxu1 %v2991_v11  ;;  %3024 = vmatpush1.bf16.msra.mxu0 %v3023_v12  ;;  %v483_v11 = vld [vmem:[#allocation7 + $0x958] sm:$0xff]  ;;  %v3043_v12 = vpack.c.bf16 %v416_v3, %v384_v2  ;;  %v196_v3 = vld [vmem:[#allocation7 + $0x60] sm:$0xff] }
 0x140   :  { %2994 = vmatprep.subr.bf16.mxu1 %v2993_v16  ;;  %3026 = vmatprep.subr.bf16.mxu0 %v3025_v17  ;;  %v480_v16 = vld [vmem:[#allocation7 + $0x940] sm:$0xff]  ;;  %v3045_v17 = vpack.c.bf16 %v481_v9, %v449_v6  ;;  %v3077_v18 = vpack.c.bf16 %v483_v11, %v451_v10  ;;  %v261_v9 = vld [vmem:[#allocation7 + $0x268] sm:$0xff]  ;;  %v263_v11 = vld [vmem:[#allocation7 + $0x278] sm:$0xff] }
 0x141   :  { %v228_v6 = vld [vmem:[#allocation7 + $0x160] sm:$0xff]  ;;  %v293_v10 = vld [vmem:[#allocation7 + $0x368] sm:$0xff] }
 0x142   :  { %v3097_v20 = vpack.c.bf16 %v293_v10, %v261_v9  ;;  %v550_v9 = vld [vmem:[#allocation7 + $0xb70] sm:$0xff]  ;;  %v581_v10 = vld [vmem:[#allocation7 + $0xc68] sm:$0xff] }
 0x143   :  { %2996 = vmatpush1.bf16.msra.mxu1 %v2995_v25  ;;  %3028 = vmatpush1.bf16.msra.mxu0 %v3027_v26  ;;  %v547_v25 = vld [vmem:[#allocation7 + $0xb58] sm:$0xff]  ;;  %v3047_v26 = vpack.c.bf16 %v480_v16, %v448_v15  ;;  %v260_v16 = vld [vmem:[#allocation7 + $0x260] sm:$0xff] }
 0x144   :  { %3030 = vmatprep.subr.bf16.mxu1 %v3029_v28  ;;  %3062 = vmatprep.subr.bf16.mxu0 %v3061_v29  ;;  %v512_v28 = vld [vmem:[#allocation7 + $0xa40] sm:$0xff]  ;;  %v3081_v31 = vpack.c.bf16 %v547_v25, %v515_v24  ;;  %v357_v24 = vld [vmem:[#allocation7 + $0x568] sm:$0xff]  ;;  %v327_v25 = vld [vmem:[#allocation7 + $0x478] sm:$0xff] }
 0x145   :  { %v544_v29 = vld [vmem:[#allocation7 + $0xb40] sm:$0xff]  ;;  %v3101_v33 = vpack.c.bf16 %v357_v24, %v325_v22  ;;  %v614_v22 = vld [vmem:[#allocation7 + $0xd70] sm:$0xff]  ;;  %v645_v24 = vld [vmem:[#allocation7 + $0xe68] sm:$0xff] }
 0x146   :  { %1107 = vmatmul.mubr.f32.vlgmr.msra.gmra.mrb[8].mxu1 %v3647_v61  ;;  %1196 = vmatmul.mubr.f32.vlgmr.msra.gmra.mrb[12].mxu0 %v3647_v61 }
 0x147   :  { %3032 = vmatpush1.bf16.msra.mxu1 %v3031_v38  ;;  %3064 = vmatpush1.bf16.msra.mxu0 %v3063_v39  ;;  %v611_v38 = vld [vmem:[#allocation7 + $0xd58] sm:$0xff]  ;;  %v3051_v39 = vpack.c.bf16 %v544_v29, %v512_v28  ;;  %v324_v29 = vld [vmem:[#allocation7 + $0x460] sm:$0xff] }
 0x148   :  { %1112 = vmatprep.mubr.f32.mxu1 %v3547_v43  ;;  %1201 = vmatprep.mubr.f32.mxu0 %v3547_v43 }
 0x149   :  { %3034 = vmatprep.subr.bf16.mxu1 %v3033_v45  ;;  %3066 = vmatprep.subr.bf16.mxu0 %v3065_v46  ;;  %v3085_v45 = vpack.c.bf16 %v611_v38, %v579_v37  ;;  %v578_v46 = vld [vmem:[#allocation7 + $0xc50] sm:$0xff]  ;;  %v421_v37 = vld [vmem:[#allocation7 + $0x768] sm:$0xff]  ;;  %v391_v38 = vld [vmem:[#allocation7 + $0x678] sm:$0xff] }
 0x14a   :  { %1113 = vmatmul.mubr.f32.gmra.mrb[10].mxu1 %v3651_v13  ;;  %1202 = vmatmul.mubr.f32.gmra.mrb[14].mxu0 %v3651_v13  ;;  %v3087_v53 = vpack.c.bf16 %v610_v47, %v578_v46  ;;  %v422_v46 = vld [vmem:[#allocation7 + $0x770] sm:$0xff]  ;;  %v453_v47 = vld [vmem:[#allocation7 + $0x868] sm:$0xff]  ;;  %v3105_v48 = vpack.c.bf16 %v421_v37, %v389_v35 }
 0x14b   :  { %3036 = vmatpush1.bf16.msra.mxu1 %v3035_v51  ;;  %3068 = vmatpush1.bf16.msra.mxu0 %v3067_v52  ;;  %v675_v51 = vld [vmem:[#allocation7 + $0xf58] sm:$0xff]  ;;  %v3055_v52 = vpack.c.bf16 %v608_v42, %v576_v41  ;;  %v388_v42 = vld [vmem:[#allocation7 + $0x660] sm:$0xff]  ;;  %v678_v35 = vld [vmem:[#allocation7 + $0xf70] sm:$0xff] }
 0x14c   :  { %1118 = vmatprep.mubr.f32.mxu1 %v3547_v43  ;;  %1207 = vmatprep.mubr.f32.mxu0 %v3547_v43  ;;  %v201_v37 = vld [vmem:[#allocation7 + $0x88] sm:$0xff] }
 0x14d   :  { %3038 = vmatprep.subr.bf16.mxu1 %v3037_v57  ;;  %3070 = vmatprep.subr.bf16.mxu0 %v3069_v58  ;;  %v3089_v57 = vpack.c.bf16 %v675_v51, %v643_v50  ;;  %v642_v58 = vld [vmem:[#allocation7 + $0xe50] sm:$0xff]  ;;  %v485_v50 = vld [vmem:[#allocation7 + $0x968] sm:$0xff]  ;;  %v455_v51 = vld [vmem:[#allocation7 + $0x878] sm:$0xff] }
 0x14e   :  { %1119 = vmatmul.mubr.f32.gmra.mrb[12].mxu1 %v3657_v23  ;;  %1208 = vmatmul.mubr.f32.gmra.mrb[16].mxu0 %v3657_v23  ;;  %v3091_v2 = vpack.c.bf16 %v674_v59, %v642_v58  ;;  %v454_v59 = vld [vmem:[#allocation7 + $0x870] sm:$0xff] }
 0x14f   :  { %3040 = vmatpush1.bf16.msra.mxu1 %v3039_v0  ;;  %3072 = vmatpush1.bf16.msra.mxu0 %v3071_v1  ;;  %v231_v0 = vld [vmem:[#allocation7 + $0x178] sm:$0xff]  ;;  %v3059_v1 = vpack.c.bf16 %v672_v55, %v640_v54  ;;  %v452_v55 = vld [vmem:[#allocation7 + $0x860] sm:$0xff] }
 0x150   :  { %1124 = vmatprep.mubr.f32.mxu1 %v3547_v43  ;;  %1213 = vmatprep.mubr.f32.mxu0 %v3547_v43  ;;  %v3125_v5 = vpack.c.bf16 %v231_v0, %v199_v63  ;;  %v549_v63 = vld [vmem:[#allocation7 + $0xb68] sm:$0xff]  ;;  %v519_v0 = vld [vmem:[#allocation7 + $0xa78] sm:$0xff] }
 0x151   :  { %3042 = vmatprep.subr.bf16.mxu1 %v3041_v7  ;;  %3074 = vmatprep.subr.bf16.mxu0 %v3073_v8  ;;  %v198_v7 = vld [vmem:[#allocation7 + $0x70] sm:$0xff] }
 0x152   :  { %1125 = vmatmul.mubr.f32.gmra.mrb[14].mxu1 %v3661_v36  ;;  %1214 = vmatmul.mubr.f32.gmra.mrb[18].mxu0 %v3661_v36  ;;  %v230_v8 = vld [vmem:[#allocation7 + $0x170] sm:$0xff] }
 0x153   :  { %3044 = vmatpush1.bf16.msra.mxu1 %v3043_v12  ;;  %3076 = vmatpush1.bf16.msra.mxu0 %v3075_v14  ;;  %v295_v12 = vld [vmem:[#allocation7 + $0x378] sm:$0xff]  ;;  %v3095_v14 = vpack.c.bf16 %v228_v6, %v196_v3  ;;  %v3127_v15 = vpack.c.bf16 %v230_v8, %v198_v7  ;;  %v3143_v3 = vpack.c.bf16 %v486_v60, %v454_v59  ;;  %v518_v8 = vld [vmem:[#allocation7 + $0xa70] sm:$0xff] }
 0x154   :  { %3046 = vmatprep.subr.bf16.mxu1 %v3045_v17  ;;  %3078 = vmatprep.subr.bf16.mxu0 %v3077_v18  ;;  %v292_v17 = vld [vmem:[#allocation7 + $0x360] sm:$0xff]  ;;  %v262_v18 = vld [vmem:[#allocation7 + $0x270] sm:$0xff]  ;;  %v3129_v21 = vpack.c.bf16 %v295_v12, %v263_v11  ;;  %v3113_v6 = vpack.c.bf16 %v549_v63, %v517_v62  ;;  %v613_v11 = vld [vmem:[#allocation7 + $0xd68] sm:$0xff] }
 0x155   :  { %1284 = vmatprep.mubr.f32.mxu1 %v3547_v43  ;;  %1373 = vmatprep.mubr.f32.mxu0 %v3547_v43  ;;  %v3131_v28 = vpack.c.bf16 %v294_v19, %v262_v18  ;;  %v583_v12 = vld [vmem:[#allocation7 + $0xc78] sm:$0xff]  ;;  %v612_v18 = vld [vmem:[#allocation7 + $0xd60] sm:$0xff]  ;;  %v3117_v19 = vpack.c.bf16 %v613_v11, %v581_v10  ;;  %v298_v59 = vld [vmem:[#allocation7 + $0x390] sm:$0xff] }
 0x156   :  { %v329_v63 = vld [vmem:[#allocation7 + $0x488] sm:$0xff] }
 0x157   :  { %3048 = vmatpush1.bf16.msra.mxu1 %v3047_v26  ;;  %3080 = vmatpush1.bf16.msra.mxu0 %v3079_v27  ;;  %v359_v26 = vld [vmem:[#allocation7 + $0x578] sm:$0xff]  ;;  %v3099_v27 = vpack.c.bf16 %v292_v17, %v260_v16  ;;  %v3147_v16 = vpack.c.bf16 %v550_v9, %v518_v8  ;;  %v580_v17 = vld [vmem:[#allocation7 + $0xc60] sm:$0xff]  ;;  %v362_v8 = vld [vmem:[#allocation7 + $0x590] sm:$0xff] }
 0x158   :  { %3050 = vmatprep.subr.bf16.mxu1 %v3049_v30  ;;  %3082 = vmatprep.subr.bf16.mxu0 %v3081_v31  ;;  %v356_v30 = vld [vmem:[#allocation7 + $0x560] sm:$0xff]  ;;  %v326_v31 = vld [vmem:[#allocation7 + $0x470] sm:$0xff]  ;;  %v3133_v34 = vpack.c.bf16 %v359_v26, %v327_v25  ;;  %v677_v25 = vld [vmem:[#allocation7 + $0xf68] sm:$0xff] }
 0x159   :  { %v3135_v41 = vpack.c.bf16 %v358_v32, %v326_v31  ;;  %v647_v26 = vld [vmem:[#allocation7 + $0xe78] sm:$0xff]  ;;  %v676_v31 = vld [vmem:[#allocation7 + $0xf60] sm:$0xff]  ;;  %v3121_v32 = vpack.c.bf16 %v677_v25, %v645_v24  ;;  %v393_v11 = vld [vmem:[#allocation7 + $0x688] sm:$0xff] }
 0x15b   :  { %3052 = vmatpush1.bf16.msra.mxu1 %v3051_v39  ;;  %3084 = vmatpush1.bf16.msra.mxu0 %v3083_v40  ;;  %v423_v39 = vld [vmem:[#allocation7 + $0x778] sm:$0xff]  ;;  %v3103_v40 = vpack.c.bf16 %v356_v30, %v324_v29  ;;  %v644_v30 = vld [vmem:[#allocation7 + $0xe60] sm:$0xff] }
 0x15c   :  { %3054 = vmatprep.subr.bf16.mxu1 %v3053_v44  ;;  %3086 = vmatprep.subr.bf16.mxu0 %v3085_v45  ;;  %v420_v44 = vld [vmem:[#allocation7 + $0x760] sm:$0xff]  ;;  %v390_v45 = vld [vmem:[#allocation7 + $0x670] sm:$0xff]  ;;  %v3137_v49 = vpack.c.bf16 %v423_v39, %v391_v38  ;;  %v233_v38 = vld [vmem:[#allocation7 + $0x188] sm:$0xff] }
 0x15d   :  { %v3139_v54 = vpack.c.bf16 %v422_v46, %v390_v45  ;;  %v203_v39 = vld [vmem:[#allocation7 + $0x98] sm:$0xff]  ;;  %v3157_v45 = vpack.c.bf16 %v233_v38, %v201_v37  ;;  %v490_v37 = vld [vmem:[#allocation7 + $0x990] sm:$0xff]  ;;  %v521_v38 = vld [vmem:[#allocation7 + $0xa88] sm:$0xff] }
 0x15f   :  { %3056 = vmatpush1.bf16.msra.mxu1 %v3055_v52  ;;  %3088 = vmatpush1.bf16.msra.mxu0 %v3087_v53  ;;  %v487_v52 = vld [vmem:[#allocation7 + $0x978] sm:$0xff]  ;;  %v3107_v53 = vpack.c.bf16 %v420_v44, %v388_v42  ;;  %v200_v44 = vld [vmem:[#allocation7 + $0x80] sm:$0xff] }
 0x160   :  { %3058 = vmatprep.subr.bf16.mxu1 %v3057_v56  ;;  %3090 = vmatprep.subr.bf16.mxu0 %v3089_v57  ;;  %v484_v56 = vld [vmem:[#allocation7 + $0x960] sm:$0xff]  ;;  %v3109_v57 = vpack.c.bf16 %v485_v50, %v453_v47  ;;  %v3141_v58 = vpack.c.bf16 %v487_v52, %v455_v51  ;;  %v265_v50 = vld [vmem:[#allocation7 + $0x288] sm:$0xff]  ;;  %v267_v52 = vld [vmem:[#allocation7 + $0x298] sm:$0xff] }
 0x161   :  { %v232_v47 = vld [vmem:[#allocation7 + $0x180] sm:$0xff]  ;;  %v297_v51 = vld [vmem:[#allocation7 + $0x388] sm:$0xff] }
 0x162   :  { %v3161_v60 = vpack.c.bf16 %v297_v51, %v265_v50  ;;  %v554_v50 = vld [vmem:[#allocation7 + $0xb90] sm:$0xff]  ;;  %v585_v51 = vld [vmem:[#allocation7 + $0xc88] sm:$0xff] }
 0x163   :  { %3060 = vmatpush1.bf16.msra.mxu1 %v3059_v1  ;;  %3092 = vmatpush1.bf16.msra.mxu0 %v3091_v2  ;;  %v551_v1 = vld [vmem:[#allocation7 + $0xb78] sm:$0xff]  ;;  %v3111_v2 = vpack.c.bf16 %v484_v56, %v452_v55  ;;  %v264_v56 = vld [vmem:[#allocation7 + $0x280] sm:$0xff] }
 0x164   :  { %3094 = vmatprep.subr.bf16.mxu1 %v3093_v4  ;;  %3126 = vmatprep.subr.bf16.mxu0 %v3125_v5  ;;  %v516_v4 = vld [vmem:[#allocation7 + $0xa60] sm:$0xff]  ;;  %v3145_v7 = vpack.c.bf16 %v551_v1, %v519_v0  ;;  %v361_v0 = vld [vmem:[#allocation7 + $0x588] sm:$0xff]  ;;  %v331_v1 = vld [vmem:[#allocation7 + $0x498] sm:$0xff] }
 0x165   :  { %v548_v5 = vld [vmem:[#allocation7 + $0xb60] sm:$0xff]  ;;  %v3165_v9 = vpack.c.bf16 %v361_v0, %v329_v63  ;;  %v618_v63 = vld [vmem:[#allocation7 + $0xd90] sm:$0xff]  ;;  %v649_v0 = vld [vmem:[#allocation7 + $0xe88] sm:$0xff] }
 0x166   :  { %1285 = vmatmul.mubr.f32.vlgmr.msra.gmra.mrb[16].mxu1 %v3647_v61  ;;  %1374 = vmatmul.mubr.f32.vlgmr.msra.gmra.mrb[20].mxu0 %v3647_v61 }
 0x167   :  { %3096 = vmatpush1.bf16.msra.mxu1 %v3095_v14  ;;  %3128 = vmatpush1.bf16.msra.mxu0 %v3127_v15  ;;  %v615_v14 = vld [vmem:[#allocation7 + $0xd78] sm:$0xff]  ;;  %v3115_v15 = vpack.c.bf16 %v548_v5, %v516_v4  ;;  %v328_v5 = vld [vmem:[#allocation7 + $0x480] sm:$0xff] }
 0x168   :  { %1290 = vmatprep.mubr.f32.mxu1 %v3547_v43  ;;  %1379 = vmatprep.mubr.f32.mxu0 %v3547_v43 }
 0x169   :  { %3098 = vmatprep.subr.bf16.mxu1 %v3097_v20  ;;  %3130 = vmatprep.subr.bf16.mxu0 %v3129_v21  ;;  %v3149_v20 = vpack.c.bf16 %v615_v14, %v583_v12  ;;  %v582_v21 = vld [vmem:[#allocation7 + $0xc70] sm:$0xff]  ;;  %v425_v12 = vld [vmem:[#allocation7 + $0x788] sm:$0xff]  ;;  %v395_v14 = vld [vmem:[#allocation7 + $0x698] sm:$0xff] }
 0x16a   :  { %1291 = vmatmul.mubr.f32.gmra.mrb[18].mxu1 %v3651_v13  ;;  %1380 = vmatmul.mubr.f32.gmra.mrb[22].mxu0 %v3651_v13  ;;  %v3151_v29 = vpack.c.bf16 %v614_v22, %v582_v21  ;;  %v426_v21 = vld [vmem:[#allocation7 + $0x790] sm:$0xff]  ;;  %v457_v22 = vld [vmem:[#allocation7 + $0x888] sm:$0xff]  ;;  %v3169_v24 = vpack.c.bf16 %v425_v12, %v393_v11 }
 0x16b   :  { %3100 = vmatpush1.bf16.msra.mxu1 %v3099_v27  ;;  %3132 = vmatpush1.bf16.msra.mxu0 %v3131_v28  ;;  %v679_v27 = vld [vmem:[#allocation7 + $0xf78] sm:$0xff]  ;;  %v3119_v28 = vpack.c.bf16 %v612_v18, %v580_v17  ;;  %v392_v18 = vld [vmem:[#allocation7 + $0x680] sm:$0xff]  ;;  %v682_v11 = vld [vmem:[#allocation7 + $0xf90] sm:$0xff] }
 0x16c   :  { %1296 = vmatprep.mubr.f32.mxu1 %v3547_v43  ;;  %1385 = vmatprep.mubr.f32.mxu0 %v3547_v43  ;;  %v205_v12 = vld [vmem:[#allocation7 + $0xa8] sm:$0xff] }
 0x16d   :  { %3102 = vmatprep.subr.bf16.mxu1 %v3101_v33  ;;  %3134 = vmatprep.subr.bf16.mxu0 %v3133_v34  ;;  %v3153_v33 = vpack.c.bf16 %v679_v27, %v647_v26  ;;  %v646_v34 = vld [vmem:[#allocation7 + $0xe70] sm:$0xff]  ;;  %v489_v26 = vld [vmem:[#allocation7 + $0x988] sm:$0xff]  ;;  %v459_v27 = vld [vmem:[#allocation7 + $0x898] sm:$0xff] }
 0x16e   :  { %1297 = vmatmul.mubr.f32.gmra.mrb[20].mxu1 %v3657_v23  ;;  %1386 = vmatmul.mubr.f32.gmra.mrb[24].mxu0 %v3657_v23  ;;  %v3155_v42 = vpack.c.bf16 %v678_v35, %v646_v34  ;;  %v458_v35 = vld [vmem:[#allocation7 + $0x890] sm:$0xff] }
 0x16f   :  { %3104 = vmatpush1.bf16.msra.mxu1 %v3103_v40  ;;  %3136 = vmatpush1.bf16.msra.mxu0 %v3135_v41  ;;  %v235_v40 = vld [vmem:[#allocation7 + $0x198] sm:$0xff]  ;;  %v3123_v41 = vpack.c.bf16 %v676_v31, %v644_v30  ;;  %v456_v31 = vld [vmem:[#allocation7 + $0x880] sm:$0xff] }
 0x170   :  { %1302 = vmatprep.mubr.f32.mxu1 %v3547_v43  ;;  %1391 = vmatprep.mubr.f32.mxu0 %v3547_v43  ;;  %v3189_v46 = vpack.c.bf16 %v235_v40, %v203_v39  ;;  %v553_v39 = vld [vmem:[#allocation7 + $0xb88] sm:$0xff]  ;;  %v523_v40 = vld [vmem:[#allocation7 + $0xa98] sm:$0xff] }
 0x171   :  { %3106 = vmatprep.subr.bf16.mxu1 %v3105_v48  ;;  %3138 = vmatprep.subr.bf16.mxu0 %v3137_v49  ;;  %v202_v48 = vld [vmem:[#allocation7 + $0x90] sm:$0xff] }
 0x172   :  { %1303 = vmatmul.mubr.f32.gmra.mrb[22].mxu1 %v3661_v36  ;;  %1392 = vmatmul.mubr.f32.gmra.mrb[26].mxu0 %v3661_v36  ;;  %v234_v49 = vld [vmem:[#allocation7 + $0x190] sm:$0xff] }
 0x173   :  { %3108 = vmatpush1.bf16.msra.mxu1 %v3107_v53  ;;  %3140 = vmatpush1.bf16.msra.mxu0 %v3139_v54  ;;  %v299_v53 = vld [vmem:[#allocation7 + $0x398] sm:$0xff]  ;;  %v3159_v54 = vpack.c.bf16 %v232_v47, %v200_v44  ;;  %v3191_v55 = vpack.c.bf16 %v234_v49, %v202_v48  ;;  %v3207_v44 = vpack.c.bf16 %v490_v37, %v458_v35  ;;  %v522_v49 = vld [vmem:[#allocation7 + $0xa90] sm:$0xff] }
 0x174   :  { %3110 = vmatprep.subr.bf16.mxu1 %v3109_v57  ;;  %3142 = vmatprep.subr.bf16.mxu0 %v3141_v58  ;;  %v296_v57 = vld [vmem:[#allocation7 + $0x380] sm:$0xff]  ;;  %v266_v58 = vld [vmem:[#allocation7 + $0x290] sm:$0xff]  ;;  %v3193_v62 = vpack.c.bf16 %v299_v53, %v267_v52  ;;  %v3177_v47 = vpack.c.bf16 %v553_v39, %v521_v38  ;;  %v617_v52 = vld [vmem:[#allocation7 + $0xd88] sm:$0xff] }
 0x175   :  { %1462 = vmatprep.mubr.f32.mxu1 %v3547_v43  ;;  %1551 = vmatprep.mubr.f32.mxu0 %v3547_v43  ;;  %v3195_v4 = vpack.c.bf16 %v298_v59, %v266_v58  ;;  %v587_v53 = vld [vmem:[#allocation7 + $0xc98] sm:$0xff]  ;;  %v616_v58 = vld [vmem:[#allocation7 + $0xd80] sm:$0xff]  ;;  %v3181_v59 = vpack.c.bf16 %v617_v52, %v585_v51  ;;  %v302_v35 = vld [vmem:[#allocation7 + $0x3b0] sm:$0xff] }
 0x176   :  { %v333_v39 = vld [vmem:[#allocation7 + $0x4a8] sm:$0xff] }
 0x177   :  { %3112 = vmatpush1.bf16.msra.mxu1 %v3111_v2  ;;  %3144 = vmatpush1.bf16.msra.mxu0 %v3143_v3  ;;  %v363_v2 = vld [vmem:[#allocation7 + $0x598] sm:$0xff]  ;;  %v3163_v3 = vpack.c.bf16 %v296_v57, %v264_v56  ;;  %v3211_v56 = vpack.c.bf16 %v554_v50, %v522_v49  ;;  %v584_v57 = vld [vmem:[#allocation7 + $0xc80] sm:$0xff]  ;;  %v366_v49 = vld [vmem:[#allocation7 + $0x5b0] sm:$0xff] }
 0x178   :  { %3114 = vmatprep.subr.bf16.mxu1 %v3113_v6  ;;  %3146 = vmatprep.subr.bf16.mxu0 %v3145_v7  ;;  %v360_v6 = vld [vmem:[#allocation7 + $0x580] sm:$0xff]  ;;  %v330_v7 = vld [vmem:[#allocation7 + $0x490] sm:$0xff]  ;;  %v3197_v10 = vpack.c.bf16 %v363_v2, %v331_v1  ;;  %v681_v1 = vld [vmem:[#allocation7 + $0xf88] sm:$0xff] }
 0x179   :  { %v3199_v17 = vpack.c.bf16 %v362_v8, %v330_v7  ;;  %v651_v2 = vld [vmem:[#allocation7 + $0xe98] sm:$0xff]  ;;  %v680_v7 = vld [vmem:[#allocation7 + $0xf80] sm:$0xff]  ;;  %v3185_v8 = vpack.c.bf16 %v681_v1, %v649_v0  ;;  %v397_v52 = vld [vmem:[#allocation7 + $0x6a8] sm:$0xff] }
 0x17b   :  { %3116 = vmatpush1.bf16.msra.mxu1 %v3115_v15  ;;  %3148 = vmatpush1.bf16.msra.mxu0 %v3147_v16  ;;  %v427_v15 = vld [vmem:[#allocation7 + $0x798] sm:$0xff]  ;;  %v3167_v16 = vpack.c.bf16 %v360_v6, %v328_v5  ;;  %v648_v6 = vld [vmem:[#allocation7 + $0xe80] sm:$0xff] }
 0x17c   :  { %3118 = vmatprep.subr.bf16.mxu1 %v3117_v19  ;;  %3150 = vmatprep.subr.bf16.mxu0 %v3149_v20  ;;  %v424_v19 = vld [vmem:[#allocation7 + $0x780] sm:$0xff]  ;;  %v394_v20 = vld [vmem:[#allocation7 + $0x690] sm:$0xff]  ;;  %v3201_v25 = vpack.c.bf16 %v427_v15, %v395_v14  ;;  %v237_v14 = vld [vmem:[#allocation7 + $0x1a8] sm:$0xff] }
 0x17d   :  { %v3203_v30 = vpack.c.bf16 %v426_v21, %v394_v20  ;;  %v207_v15 = vld [vmem:[#allocation7 + $0xb8] sm:$0xff]  ;;  %v3221_v20 = vpack.c.bf16 %v237_v14, %v205_v12  ;;  %v494_v12 = vld [vmem:[#allocation7 + $0x9b0] sm:$0xff]  ;;  %v525_v14 = vld [vmem:[#allocation7 + $0xaa8] sm:$0xff] }
 0x17f   :  { %3120 = vmatpush1.bf16.msra.mxu1 %v3119_v28  ;;  %3152 = vmatpush1.bf16.msra.mxu0 %v3151_v29  ;;  %v491_v28 = vld [vmem:[#allocation7 + $0x998] sm:$0xff]  ;;  %v3171_v29 = vpack.c.bf16 %v424_v19, %v392_v18  ;;  %v204_v19 = vld [vmem:[#allocation7 + $0xa0] sm:$0xff] }
 0x180   :  { %3122 = vmatprep.subr.bf16.mxu1 %v3121_v32  ;;  %3154 = vmatprep.subr.bf16.mxu0 %v3153_v33  ;;  %v488_v32 = vld [vmem:[#allocation7 + $0x980] sm:$0xff]  ;;  %v3173_v33 = vpack.c.bf16 %v489_v26, %v457_v22  ;;  %v3205_v34 = vpack.c.bf16 %v491_v28, %v459_v27  ;;  %v269_v26 = vld [vmem:[#allocation7 + $0x2a8] sm:$0xff]  ;;  %v271_v28 = vld [vmem:[#allocation7 + $0x2b8] sm:$0xff] }
 0x181   :  { %v236_v22 = vld [vmem:[#allocation7 + $0x1a0] sm:$0xff]  ;;  %v301_v27 = vld [vmem:[#allocation7 + $0x3a8] sm:$0xff] }
 0x182   :  { %v3225_v37 = vpack.c.bf16 %v301_v27, %v269_v26  ;;  %v558_v26 = vld [vmem:[#allocation7 + $0xbb0] sm:$0xff]  ;;  %v589_v27 = vld [vmem:[#allocation7 + $0xca8] sm:$0xff] }
 0x183   :  { %3124 = vmatpush1.bf16.msra.mxu1 %v3123_v41  ;;  %3156 = vmatpush1.bf16.msra.mxu0 %v3155_v42  ;;  %v555_v41 = vld [vmem:[#allocation7 + $0xb98] sm:$0xff]  ;;  %v3175_v42 = vpack.c.bf16 %v488_v32, %v456_v31  ;;  %v268_v32 = vld [vmem:[#allocation7 + $0x2a0] sm:$0xff] }
 0x184   :  { %3158 = vmatprep.subr.bf16.mxu1 %v3157_v45  ;;  %3190 = vmatprep.subr.bf16.mxu0 %v3189_v46  ;;  %v520_v45 = vld [vmem:[#allocation7 + $0xa80] sm:$0xff]  ;;  %v3209_v48 = vpack.c.bf16 %v555_v41, %v523_v40  ;;  %v365_v40 = vld [vmem:[#allocation7 + $0x5a8] sm:$0xff]  ;;  %v335_v41 = vld [vmem:[#allocation7 + $0x4b8] sm:$0xff] }
 0x185   :  { %v552_v46 = vld [vmem:[#allocation7 + $0xb80] sm:$0xff]  ;;  %v3229_v50 = vpack.c.bf16 %v365_v40, %v333_v39  ;;  %v622_v39 = vld [vmem:[#allocation7 + $0xdb0] sm:$0xff]  ;;  %v653_v40 = vld [vmem:[#allocation7 + $0xea8] sm:$0xff] }
 0x186   :  { %1463 = vmatmul.mubr.f32.vlgmr.msra.gmra.mrb[24].mxu1 %v3647_v61  ;;  %1552 = vmatmul.mubr.f32.vlgmr.msra.gmra.mrb[28].mxu0 %v3647_v61 }
 0x187   :  { %3160 = vmatpush1.bf16.msra.mxu1 %v3159_v54  ;;  %3192 = vmatpush1.bf16.msra.mxu0 %v3191_v55  ;;  %v619_v54 = vld [vmem:[#allocation7 + $0xd98] sm:$0xff]  ;;  %v3179_v55 = vpack.c.bf16 %v552_v46, %v520_v45  ;;  %v332_v46 = vld [vmem:[#allocation7 + $0x4a0] sm:$0xff] }
 0x188   :  { %1468 = vmatprep.mubr.f32.mxu1 %v3547_v43  ;;  %1557 = vmatprep.mubr.f32.mxu0 %v3547_v43 }
 0x189   :  { %3162 = vmatprep.subr.bf16.mxu1 %v3161_v60  ;;  %3194 = vmatprep.subr.bf16.mxu0 %v3193_v62  ;;  %v3213_v60 = vpack.c.bf16 %v619_v54, %v587_v53  ;;  %v586_v62 = vld [vmem:[#allocation7 + $0xc90] sm:$0xff]  ;;  %v429_v53 = vld [vmem:[#allocation7 + $0x7a8] sm:$0xff]  ;;  %v399_v54 = vld [vmem:[#allocation7 + $0x6b8] sm:$0xff] }
 0x18a   :  { %1469 = vmatmul.mubr.f32.gmra.mrb[26].mxu1 %v3651_v13  ;;  %1558 = vmatmul.mubr.f32.gmra.mrb[30].mxu0 %v3651_v13  ;;  %v3215_v5 = vpack.c.bf16 %v618_v63, %v586_v62  ;;  %v430_v62 = vld [vmem:[#allocation7 + $0x7b0] sm:$0xff]  ;;  %v461_v63 = vld [vmem:[#allocation7 + $0x8a8] sm:$0xff]  ;;  %v3233_v0 = vpack.c.bf16 %v429_v53, %v397_v52 }
 0x18b   :  { %3164 = vmatpush1.bf16.msra.mxu1 %v3163_v3  ;;  %3196 = vmatpush1.bf16.msra.mxu0 %v3195_v4  ;;  %v683_v3 = vld [vmem:[#allocation7 + $0xf98] sm:$0xff]  ;;  %v3183_v4 = vpack.c.bf16 %v616_v58, %v584_v57  ;;  %v396_v58 = vld [vmem:[#allocation7 + $0x6a0] sm:$0xff]  ;;  %v686_v52 = vld [vmem:[#allocation7 + $0xfb0] sm:$0xff] }
 0x18c   :  { %1474 = vmatprep.mubr.f32.mxu1 %v3547_v43  ;;  %1563 = vmatprep.mubr.f32.mxu0 %v3547_v43  ;;  %v209_v53 = vld [vmem:[#allocation7 + $0xc8] sm:$0xff] }
 0x18d   :  { %3166 = vmatprep.subr.bf16.mxu1 %v3165_v9  ;;  %3198 = vmatprep.subr.bf16.mxu0 %v3197_v10  ;;  %v3217_v9 = vpack.c.bf16 %v683_v3, %v651_v2  ;;  %v650_v10 = vld [vmem:[#allocation7 + $0xe90] sm:$0xff]  ;;  %v493_v2 = vld [vmem:[#allocation7 + $0x9a8] sm:$0xff]  ;;  %v463_v3 = vld [vmem:[#allocation7 + $0x8b8] sm:$0xff] }
 0x18e   :  { %1475 = vmatmul.mubr.f32.gmra.mrb[28].mxu1 %v3657_v23  ;;  %1564 = vmatmul.mubr.f32.gmra.mrb[32].mxu0 %v3657_v23  ;;  %v3219_v18 = vpack.c.bf16 %v682_v11, %v650_v10  ;;  %v462_v11 = vld [vmem:[#allocation7 + $0x8b0] sm:$0xff] }
 0x18f   :  { %3168 = vmatpush1.bf16.msra.mxu1 %v3167_v16  ;;  %3200 = vmatpush1.bf16.msra.mxu0 %v3199_v17  ;;  %v239_v16 = vld [vmem:[#allocation7 + $0x1b8] sm:$0xff]  ;;  %v3187_v17 = vpack.c.bf16 %v680_v7, %v648_v6  ;;  %v460_v7 = vld [vmem:[#allocation7 + $0x8a0] sm:$0xff] }
 0x190   :  { %1480 = vmatprep.mubr.f32.mxu1 %v3547_v43  ;;  %1569 = vmatprep.mubr.f32.mxu0 %v3547_v43  ;;  %v3253_v21 = vpack.c.bf16 %v239_v16, %v207_v15  ;;  %v557_v15 = vld [vmem:[#allocation7 + $0xba8] sm:$0xff]  ;;  %v527_v16 = vld [vmem:[#allocation7 + $0xab8] sm:$0xff] }
 0x191   :  { %3170 = vmatprep.subr.bf16.mxu1 %v3169_v24  ;;  %3202 = vmatprep.subr.bf16.mxu0 %v3201_v25  ;;  %v206_v24 = vld [vmem:[#allocation7 + $0xb0] sm:$0xff] }
 0x192   :  { %1481 = vmatmul.mubr.f32.gmra.mrb[30].mxu1 %v3661_v36  ;;  %1570 = vmatmul.mubr.f32.gmra.mrb[34].mxu0 %v3661_v36  ;;  %v238_v25 = vld [vmem:[#allocation7 + $0x1b0] sm:$0xff] }
 0x193   :  { %3172 = vmatpush1.bf16.msra.mxu1 %v3171_v29  ;;  %3204 = vmatpush1.bf16.msra.mxu0 %v3203_v30  ;;  %v303_v29 = vld [vmem:[#allocation7 + $0x3b8] sm:$0xff]  ;;  %v3223_v30 = vpack.c.bf16 %v236_v22, %v204_v19  ;;  %v3255_v31 = vpack.c.bf16 %v238_v25, %v206_v24  ;;  %v3271_v19 = vpack.c.bf16 %v494_v12, %v462_v11  ;;  %v526_v25 = vld [vmem:[#allocation7 + $0xab0] sm:$0xff] }
 0x194   :  { %3174 = vmatprep.subr.bf16.mxu1 %v3173_v33  ;;  %3206 = vmatprep.subr.bf16.mxu0 %v3205_v34  ;;  %v300_v33 = vld [vmem:[#allocation7 + $0x3a0] sm:$0xff]  ;;  %v270_v34 = vld [vmem:[#allocation7 + $0x2b0] sm:$0xff]  ;;  %v3257_v38 = vpack.c.bf16 %v303_v29, %v271_v28  ;;  %v3241_v22 = vpack.c.bf16 %v557_v15, %v525_v14  ;;  %v621_v28 = vld [vmem:[#allocation7 + $0xda8] sm:$0xff] }
 0x195   :  { %1640 = vmatprep.mubr.f32.mxu1 %v3547_v43  ;;  %1729 = vmatprep.mubr.f32.mxu0 %v3547_v43  ;;  %v3259_v45 = vpack.c.bf16 %v302_v35, %v270_v34  ;;  %v591_v29 = vld [vmem:[#allocation7 + $0xcb8] sm:$0xff]  ;;  %v620_v34 = vld [vmem:[#allocation7 + $0xda0] sm:$0xff]  ;;  %v3245_v35 = vpack.c.bf16 %v621_v28, %v589_v27  ;;  %v306_v11 = vld [vmem:[#allocation7 + $0x3d0] sm:$0xff] }
 0x196   :  { %v337_v15 = vld [vmem:[#allocation7 + $0x4c8] sm:$0xff] }
 0x197   :  { %3176 = vmatpush1.bf16.msra.mxu1 %v3175_v42  ;;  %3208 = vmatpush1.bf16.msra.mxu0 %v3207_v44  ;;  %v367_v42 = vld [vmem:[#allocation7 + $0x5b8] sm:$0xff]  ;;  %v3227_v44 = vpack.c.bf16 %v300_v33, %v268_v32  ;;  %v3275_v32 = vpack.c.bf16 %v558_v26, %v526_v25  ;;  %v588_v33 = vld [vmem:[#allocation7 + $0xca0] sm:$0xff]  ;;  %v370_v25 = vld [vmem:[#allocation7 + $0x5d0] sm:$0xff] }
 0x198   :  { %3178 = vmatprep.subr.bf16.mxu1 %v3177_v47  ;;  %3210 = vmatprep.subr.bf16.mxu0 %v3209_v48  ;;  %v364_v47 = vld [vmem:[#allocation7 + $0x5a0] sm:$0xff]  ;;  %v334_v48 = vld [vmem:[#allocation7 + $0x4b0] sm:$0xff]  ;;  %v3261_v51 = vpack.c.bf16 %v367_v42, %v335_v41  ;;  %v685_v41 = vld [vmem:[#allocation7 + $0xfa8] sm:$0xff] }
 0x199   :  { %v3263_v57 = vpack.c.bf16 %v366_v49, %v334_v48  ;;  %v655_v42 = vld [vmem:[#allocation7 + $0xeb8] sm:$0xff]  ;;  %v684_v48 = vld [vmem:[#allocation7 + $0xfa0] sm:$0xff]  ;;  %v3249_v49 = vpack.c.bf16 %v685_v41, %v653_v40  ;;  %v401_v28 = vld [vmem:[#allocation7 + $0x6c8] sm:$0xff] }
 0x19b   :  { %3180 = vmatpush1.bf16.msra.mxu1 %v3179_v55  ;;  %3212 = vmatpush1.bf16.msra.mxu0 %v3211_v56  ;;  %v431_v55 = vld [vmem:[#allocation7 + $0x7b8] sm:$0xff]  ;;  %v3231_v56 = vpack.c.bf16 %v364_v47, %v332_v46  ;;  %v652_v47 = vld [vmem:[#allocation7 + $0xea0] sm:$0xff] }
 0x19c   :  { %3182 = vmatprep.subr.bf16.mxu1 %v3181_v59  ;;  %3214 = vmatprep.subr.bf16.mxu0 %v3213_v60  ;;  %v428_v59 = vld [vmem:[#allocation7 + $0x7a0] sm:$0xff]  ;;  %v398_v60 = vld [vmem:[#allocation7 + $0x6b0] sm:$0xff]  ;;  %v3265_v1 = vpack.c.bf16 %v431_v55, %v399_v54  ;;  %v241_v54 = vld [vmem:[#allocation7 + $0x1c8] sm:$0xff] }
 0x19d   :  { %v3267_v6 = vpack.c.bf16 %v430_v62, %v398_v60  ;;  %v211_v55 = vld [vmem:[#allocation7 + $0xd8] sm:$0xff]  ;;  %v3285_v60 = vpack.c.bf16 %v241_v54, %v209_v53  ;;  %v498_v53 = vld [vmem:[#allocation7 + $0x9d0] sm:$0xff]  ;;  %v529_v54 = vld [vmem:[#allocation7 + $0xac8] sm:$0xff] }
 0x19f   :  { %3184 = vmatpush1.bf16.msra.mxu1 %v3183_v4  ;;  %3216 = vmatpush1.bf16.msra.mxu0 %v3215_v5  ;;  %v495_v4 = vld [vmem:[#allocation7 + $0x9b8] sm:$0xff]  ;;  %v3235_v5 = vpack.c.bf16 %v428_v59, %v396_v58  ;;  %v208_v59 = vld [vmem:[#allocation7 + $0xc0] sm:$0xff] }
 0x1a0   :  { %3186 = vmatprep.subr.bf16.mxu1 %v3185_v8  ;;  %3218 = vmatprep.subr.bf16.mxu0 %v3217_v9  ;;  %v492_v8 = vld [vmem:[#allocation7 + $0x9a0] sm:$0xff]  ;;  %v3237_v9 = vpack.c.bf16 %v493_v2, %v461_v63  ;;  %v3269_v10 = vpack.c.bf16 %v495_v4, %v463_v3  ;;  %v273_v2 = vld [vmem:[#allocation7 + $0x2c8] sm:$0xff]  ;;  %v275_v4 = vld [vmem:[#allocation7 + $0x2d8] sm:$0xff] }
 0x1a1   :  { %v240_v63 = vld [vmem:[#allocation7 + $0x1c0] sm:$0xff]  ;;  %v305_v3 = vld [vmem:[#allocation7 + $0x3c8] sm:$0xff] }
 0x1a2   :  { %v3289_v12 = vpack.c.bf16 %v305_v3, %v273_v2  ;;  %v562_v2 = vld [vmem:[#allocation7 + $0xbd0] sm:$0xff]  ;;  %v593_v3 = vld [vmem:[#allocation7 + $0xcc8] sm:$0xff] }
 0x1a3   :  { %3188 = vmatpush1.bf16.msra.mxu1 %v3187_v17  ;;  %3220 = vmatpush1.bf16.msra.mxu0 %v3219_v18  ;;  %v559_v17 = vld [vmem:[#allocation7 + $0xbb8] sm:$0xff]  ;;  %v3239_v18 = vpack.c.bf16 %v492_v8, %v460_v7  ;;  %v272_v8 = vld [vmem:[#allocation7 + $0x2c0] sm:$0xff] }
 0x1a4   :  { %3222 = vmatprep.subr.bf16.mxu1 %v3221_v20  ;;  %3254 = vmatprep.subr.bf16.mxu0 %v3253_v21  ;;  %v524_v20 = vld [vmem:[#allocation7 + $0xaa0] sm:$0xff]  ;;  %v3273_v24 = vpack.c.bf16 %v559_v17, %v527_v16  ;;  %v369_v16 = vld [vmem:[#allocation7 + $0x5c8] sm:$0xff]  ;;  %v339_v17 = vld [vmem:[#allocation7 + $0x4d8] sm:$0xff] }
 0x1a5   :  { %v556_v21 = vld [vmem:[#allocation7 + $0xba0] sm:$0xff]  ;;  %v3293_v26 = vpack.c.bf16 %v369_v16, %v337_v15  ;;  %v626_v15 = vld [vmem:[#allocation7 + $0xdd0] sm:$0xff]  ;;  %v657_v16 = vld [vmem:[#allocation7 + $0xec8] sm:$0xff] }
 0x1a6   :  { %1641 = vmatmul.mubr.f32.vlgmr.msra.gmra.mrb[32].mxu1 %v3647_v61  ;;  %1730 = vmatmul.mubr.f32.vlgmr.msra.gmra.mrb[36].mxu0 %v3647_v61 }
 0x1a7   :  { %3224 = vmatpush1.bf16.msra.mxu1 %v3223_v30  ;;  %3256 = vmatpush1.bf16.msra.mxu0 %v3255_v31  ;;  %v623_v30 = vld [vmem:[#allocation7 + $0xdb8] sm:$0xff]  ;;  %v3243_v31 = vpack.c.bf16 %v556_v21, %v524_v20  ;;  %v336_v21 = vld [vmem:[#allocation7 + $0x4c0] sm:$0xff] }
 0x1a8   :  { %1646 = vmatprep.mubr.f32.mxu1 %v3547_v43  ;;  %1735 = vmatprep.mubr.f32.mxu0 %v3547_v43 }
 0x1a9   :  { %3226 = vmatprep.subr.bf16.mxu1 %v3225_v37  ;;  %3258 = vmatprep.subr.bf16.mxu0 %v3257_v38  ;;  %v3277_v37 = vpack.c.bf16 %v623_v30, %v591_v29  ;;  %v590_v38 = vld [vmem:[#allocation7 + $0xcb0] sm:$0xff]  ;;  %v433_v29 = vld [vmem:[#allocation7 + $0x7c8] sm:$0xff]  ;;  %v403_v30 = vld [vmem:[#allocation7 + $0x6d8] sm:$0xff] }
 0x1aa   :  { %1647 = vmatmul.mubr.f32.gmra.mrb[34].mxu1 %v3651_v13  ;;  %1736 = vmatmul.mubr.f32.gmra.mrb[38].mxu0 %v3651_v13  ;;  %v3279_v46 = vpack.c.bf16 %v622_v39, %v590_v38  ;;  %v434_v38 = vld [vmem:[#allocation7 + $0x7d0] sm:$0xff]  ;;  %v465_v39 = vld [vmem:[#allocation7 + $0x8c8] sm:$0xff]  ;;  %v3297_v40 = vpack.c.bf16 %v433_v29, %v401_v28 }
 0x1ab   :  { %3228 = vmatpush1.bf16.msra.mxu1 %v3227_v44  ;;  %3260 = vmatpush1.bf16.msra.mxu0 %v3259_v45  ;;  %v687_v44 = vld [vmem:[#allocation7 + $0xfb8] sm:$0xff]  ;;  %v3247_v45 = vpack.c.bf16 %v620_v34, %v588_v33  ;;  %v400_v34 = vld [vmem:[#allocation7 + $0x6c0] sm:$0xff]  ;;  %v690_v28 = vld [vmem:[#allocation7 + $0xfd0] sm:$0xff] }
 0x1ac   :  { %1652 = vmatprep.mubr.f32.mxu1 %v3547_v43  ;;  %1741 = vmatprep.mubr.f32.mxu0 %v3547_v43  ;;  %v213_v29 = vld [vmem:[#allocation7 + $0xe8] sm:$0xff] }
 0x1ad   :  { %3230 = vmatprep.subr.bf16.mxu1 %v3229_v50  ;;  %3262 = vmatprep.subr.bf16.mxu0 %v3261_v51  ;;  %v3281_v50 = vpack.c.bf16 %v687_v44, %v655_v42  ;;  %v654_v51 = vld [vmem:[#allocation7 + $0xeb0] sm:$0xff]  ;;  %v497_v42 = vld [vmem:[#allocation7 + $0x9c8] sm:$0xff]  ;;  %v467_v44 = vld [vmem:[#allocation7 + $0x8d8] sm:$0xff] }
 0x1ae   :  { %1653 = vmatmul.mubr.f32.gmra.mrb[36].mxu1 %v3657_v23  ;;  %1742 = vmatmul.mubr.f32.gmra.mrb[40].mxu0 %v3657_v23  ;;  %v3283_v58 = vpack.c.bf16 %v686_v52, %v654_v51  ;;  %v466_v52 = vld [vmem:[#allocation7 + $0x8d0] sm:$0xff] }
 0x1af   :  { %3232 = vmatpush1.bf16.msra.mxu1 %v3231_v56  ;;  %3264 = vmatpush1.bf16.msra.mxu0 %v3263_v57  ;;  %v243_v56 = vld [vmem:[#allocation7 + $0x1d8] sm:$0xff]  ;;  %v3251_v57 = vpack.c.bf16 %v684_v48, %v652_v47  ;;  %v464_v48 = vld [vmem:[#allocation7 + $0x8c0] sm:$0xff] }
 0x1b0   :  { %1658 = vmatprep.mubr.f32.mxu1 %v3547_v43  ;;  %1747 = vmatprep.mubr.f32.mxu0 %v3547_v43  ;;  %v3317_v62 = vpack.c.bf16 %v243_v56, %v211_v55  ;;  %v561_v55 = vld [vmem:[#allocation7 + $0xbc8] sm:$0xff]  ;;  %v531_v56 = vld [vmem:[#allocation7 + $0xad8] sm:$0xff] }
 0x1b1   :  { %3234 = vmatprep.subr.bf16.mxu1 %v3233_v0  ;;  %3266 = vmatprep.subr.bf16.mxu0 %v3265_v1  ;;  %v210_v0 = vld [vmem:[#allocation7 + $0xd0] sm:$0xff] }
 0x1b2   :  { %1659 = vmatmul.mubr.f32.gmra.mrb[38].mxu1 %v3661_v36  ;;  %1748 = vmatmul.mubr.f32.gmra.mrb[42].mxu0 %v3661_v36  ;;  %v242_v1 = vld [vmem:[#allocation7 + $0x1d0] sm:$0xff] }
 0x1b3   :  { %3236 = vmatpush1.bf16.msra.mxu1 %v3235_v5  ;;  %3268 = vmatpush1.bf16.msra.mxu0 %v3267_v6  ;;  %v307_v5 = vld [vmem:[#allocation7 + $0x3d8] sm:$0xff]  ;;  %v3287_v6 = vpack.c.bf16 %v240_v63, %v208_v59  ;;  %v3319_v7 = vpack.c.bf16 %v242_v1, %v210_v0  ;;  %v3335_v59 = vpack.c.bf16 %v498_v53, %v466_v52  ;;  %v530_v1 = vld [vmem:[#allocation7 + $0xad0] sm:$0xff] }
 0x1b4   :  { %3238 = vmatprep.subr.bf16.mxu1 %v3237_v9  ;;  %3270 = vmatprep.subr.bf16.mxu0 %v3269_v10  ;;  %v304_v9 = vld [vmem:[#allocation7 + $0x3c0] sm:$0xff]  ;;  %v274_v10 = vld [vmem:[#allocation7 + $0x2d0] sm:$0xff]  ;;  %v3321_v14 = vpack.c.bf16 %v307_v5, %v275_v4  ;;  %v3305_v63 = vpack.c.bf16 %v561_v55, %v529_v54  ;;  %v625_v4 = vld [vmem:[#allocation7 + $0xdc8] sm:$0xff] }
 0x1b5   :  { %1818 = vmatprep.mubr.f32.mxu1 %v3547_v43  ;;  %1907 = vmatprep.mubr.f32.mxu0 %v3547_v43  ;;  %v3323_v20 = vpack.c.bf16 %v306_v11, %v274_v10  ;;  %v595_v5 = vld [vmem:[#allocation7 + $0xcd8] sm:$0xff]  ;;  %v624_v10 = vld [vmem:[#allocation7 + $0xdc0] sm:$0xff]  ;;  %v3309_v11 = vpack.c.bf16 %v625_v4, %v593_v3  ;;  %v310_v52 = vld [vmem:[#allocation7 + $0x3f0] sm:$0xff] }
 0x1b6   :  { %v341_v55 = vld [vmem:[#allocation7 + $0x4e8] sm:$0xff] }
 0x1b7   :  { %3240 = vmatpush1.bf16.msra.mxu1 %v3239_v18  ;;  %3272 = vmatpush1.bf16.msra.mxu0 %v3271_v19  ;;  %v371_v18 = vld [vmem:[#allocation7 + $0x5d8] sm:$0xff]  ;;  %v3291_v19 = vpack.c.bf16 %v304_v9, %v272_v8  ;;  %v3339_v8 = vpack.c.bf16 %v562_v2, %v530_v1  ;;  %v592_v9 = vld [vmem:[#allocation7 + $0xcc0] sm:$0xff]  ;;  %v374_v1 = vld [vmem:[#allocation7 + $0x5f0] sm:$0xff] }
 0x1b8   :  { %3242 = vmatprep.subr.bf16.mxu1 %v3241_v22  ;;  %3274 = vmatprep.subr.bf16.mxu0 %v3273_v24  ;;  %v368_v22 = vld [vmem:[#allocation7 + $0x5c0] sm:$0xff]  ;;  %v338_v24 = vld [vmem:[#allocation7 + $0x4d0] sm:$0xff]  ;;  %v3325_v27 = vpack.c.bf16 %v371_v18, %v339_v17  ;;  %v689_v17 = vld [vmem:[#allocation7 + $0xfc8] sm:$0xff] }
 0x1b9   :  { %v3327_v33 = vpack.c.bf16 %v370_v25, %v338_v24  ;;  %v659_v18 = vld [vmem:[#allocation7 + $0xed8] sm:$0xff]  ;;  %v688_v24 = vld [vmem:[#allocation7 + $0xfc0] sm:$0xff]  ;;  %v3313_v25 = vpack.c.bf16 %v689_v17, %v657_v16  ;;  %v405_v4 = vld [vmem:[#allocation7 + $0x6e8] sm:$0xff] }
 0x1ba   :  { %v469_v16 = vld [vmem:[#allocation7 + $0x8e8] sm:$0xff] }
 0x1bb   :  { %3244 = vmatpush1.bf16.msra.mxu1 %v3243_v31  ;;  %3276 = vmatpush1.bf16.msra.mxu0 %v3275_v32  ;;  %v435_v31 = vld [vmem:[#allocation7 + $0x7d8] sm:$0xff]  ;;  %v3295_v32 = vpack.c.bf16 %v368_v22, %v336_v21  ;;  %v656_v22 = vld [vmem:[#allocation7 + $0xec0] sm:$0xff] }
 0x1bc   :  { %3246 = vmatprep.subr.bf16.mxu1 %v3245_v35  ;;  %3278 = vmatprep.subr.bf16.mxu0 %v3277_v37  ;;  %v432_v35 = vld [vmem:[#allocation7 + $0x7c0] sm:$0xff]  ;;  %v402_v37 = vld [vmem:[#allocation7 + $0x6d0] sm:$0xff]  ;;  %v3329_v41 = vpack.c.bf16 %v435_v31, %v403_v30  ;;  %v245_v30 = vld [vmem:[#allocation7 + $0x1e8] sm:$0xff] }
 0x1bd   :  { %v3331_v47 = vpack.c.bf16 %v434_v38, %v402_v37  ;;  %v215_v31 = vld [vmem:[#allocation7 + $0xf8] sm:$0xff]  ;;  %v3349_v37 = vpack.c.bf16 %v245_v30, %v213_v29  ;;  %v470_v30 = vld [vmem:[#allocation7 + $0x8f0] sm:$0xff] }
 0x1bf   :  { %3248 = vmatpush1.bf16.msra.mxu1 %v3247_v45  ;;  %3280 = vmatpush1.bf16.msra.mxu0 %v3279_v46  ;;  %v499_v45 = vld [vmem:[#allocation7 + $0x9d8] sm:$0xff]  ;;  %v3299_v46 = vpack.c.bf16 %v432_v35, %v400_v34  ;;  %v212_v35 = vld [vmem:[#allocation7 + $0xe0] sm:$0xff] }
 0x1c0   :  { %3250 = vmatprep.subr.bf16.mxu1 %v3249_v49  ;;  %3282 = vmatprep.subr.bf16.mxu0 %v3281_v50  ;;  %v496_v49 = vld [vmem:[#allocation7 + $0x9c0] sm:$0xff]  ;;  %v3301_v50 = vpack.c.bf16 %v497_v42, %v465_v39  ;;  %v3333_v51 = vpack.c.bf16 %v499_v45, %v467_v44  ;;  %v277_v42 = vld [vmem:[#allocation7 + $0x2e8] sm:$0xff]  ;;  %v279_v45 = vld [vmem:[#allocation7 + $0x2f8] sm:$0xff] }
 0x1c1   :  { %v244_v39 = vld [vmem:[#allocation7 + $0x1e0] sm:$0xff]  ;;  %v309_v44 = vld [vmem:[#allocation7 + $0x3e8] sm:$0xff] }
 0x1c2   :  { %v3353_v53 = vpack.c.bf16 %v309_v44, %v277_v42  ;;  %v3776_v42 = vld [vmem:[#allocation8] sm:$0xff] }
 0x1c3   :  { %3252 = vmatpush1.bf16.msra.mxu1 %v3251_v57  ;;  %3284 = vmatpush1.bf16.msra.mxu0 %v3283_v58  ;;  %v563_v57 = vld [vmem:[#allocation7 + $0xbd8] sm:$0xff]  ;;  %v3303_v58 = vpack.c.bf16 %v496_v49, %v464_v48  ;;  %v276_v49 = vld [vmem:[#allocation7 + $0x2e0] sm:$0xff] }
 0x1c4   :  { %3286 = vmatprep.subr.bf16.mxu1 %v3285_v60  ;;  %3318 = vmatprep.subr.bf16.mxu0 %v3317_v62  ;;  %v528_v60 = vld [vmem:[#allocation7 + $0xac0] sm:$0xff]  ;;  %v3337_v0 = vpack.c.bf16 %v563_v57, %v531_v56  ;;  %v373_v56 = vld [vmem:[#allocation7 + $0x5e8] sm:$0xff]  ;;  %v343_v57 = vld [vmem:[#allocation7 + $0x4f8] sm:$0xff] }
 0x1c5   :  { %v560_v62 = vld [vmem:[#allocation7 + $0xbc0] sm:$0xff]  ;;  %v3357_v2 = vpack.c.bf16 %v373_v56, %v341_v55 }
 0x1c6   :  { %1819 = vmatmul.mubr.f32.vlgmr.msra.gmra.mrb[40].mxu1 %v3647_v61  ;;  %1908 = vmatmul.mubr.f32.vlgmr.msra.gmra.mrb[44].mxu0 %v3647_v61 }
 0x1c7   :  { %3288 = vmatpush1.bf16.msra.mxu1 %v3287_v6  ;;  %3320 = vmatpush1.bf16.msra.mxu0 %v3319_v7  ;;  %v627_v6 = vld [vmem:[#allocation7 + $0xdd8] sm:$0xff]  ;;  %v3307_v7 = vpack.c.bf16 %v560_v62, %v528_v60  ;;  %v340_v62 = vld [vmem:[#allocation7 + $0x4e0] sm:$0xff] }
 0x1c8   :  { %1824 = vmatprep.mubr.f32.mxu1 %v3547_v43  ;;  %1913 = vmatprep.mubr.f32.mxu0 %v3547_v43 }
 0x1c9   :  { %3290 = vmatprep.subr.bf16.mxu1 %v3289_v12  ;;  %3322 = vmatprep.subr.bf16.mxu0 %v3321_v14  ;;  %v3341_v12 = vpack.c.bf16 %v627_v6, %v595_v5  ;;  %v594_v14 = vld [vmem:[#allocation7 + $0xcd0] sm:$0xff]  ;;  %v437_v5 = vld [vmem:[#allocation7 + $0x7e8] sm:$0xff]  ;;  %v407_v6 = vld [vmem:[#allocation7 + $0x6f8] sm:$0xff] }
 0x1ca   :  { %1825 = vmatmul.mubr.f32.gmra.mrb[42].mxu1 %v3651_v13  ;;  %1914 = vmatmul.mubr.f32.gmra.mrb[46].mxu0 %v3651_v13  ;;  %v3343_v21 = vpack.c.bf16 %v626_v15, %v594_v14  ;;  %v406_v14 = vld [vmem:[#allocation7 + $0x6f0] sm:$0xff]  ;;  %v3361_v17 = vpack.c.bf16 %v437_v5, %v405_v4  ;;  %v661_v4 = vld [vmem:[#allocation7 + $0xee8] sm:$0xff] }
 0x1cb   :  { %3292 = vmatpush1.bf16.msra.mxu1 %v3291_v19  ;;  %3324 = vmatpush1.bf16.msra.mxu0 %v3323_v20  ;;  %v691_v19 = vld [vmem:[#allocation7 + $0xfd8] sm:$0xff]  ;;  %v3311_v20 = vpack.c.bf16 %v624_v10, %v592_v9  ;;  %v438_v15 = vld [vmem:[#allocation7 + $0x7f0] sm:$0xff] }
 0x1cc   :  { %1830 = vmatprep.mubr.f32.mxu1 %v3547_v43  ;;  %1919 = vmatprep.mubr.f32.mxu0 %v3547_v43 }
 0x1cd   :  { %3294 = vmatprep.subr.bf16.mxu1 %v3293_v26  ;;  %3326 = vmatprep.subr.bf16.mxu0 %v3325_v27  ;;  %v3345_v26 = vpack.c.bf16 %v691_v19, %v659_v18  ;;  %v658_v27 = vld [vmem:[#allocation7 + $0xed0] sm:$0xff]  ;;  %v501_v19 = vld [vmem:[#allocation7 + $0x9e8] sm:$0xff] }
 0x1ce   :  { %1831 = vmatmul.mubr.f32.gmra.mrb[44].mxu1 %v3657_v23  ;;  %1920 = vmatmul.mubr.f32.gmra.mrb[48].mxu0 %v3657_v23  ;;  %v3347_v34 = vpack.c.bf16 %v690_v28, %v658_v27  ;;  %v500_v27 = vld [vmem:[#allocation7 + $0x9e0] sm:$0xff]  ;;  %v3365_v28 = vpack.c.bf16 %v501_v19, %v469_v16 }
 0x1cf   :  { %3296 = vmatpush1.bf16.msra.mxu1 %v3295_v32  ;;  %3328 = vmatpush1.bf16.msra.mxu0 %v3327_v33  ;;  %v247_v32 = vld [vmem:[#allocation7 + $0x1f8] sm:$0xff]  ;;  %v3315_v33 = vpack.c.bf16 %v688_v24, %v656_v22  ;;  %v660_v19 = vld [vmem:[#allocation7 + $0xee0] sm:$0xff] }
 0x1d0   :  { %1836 = vmatprep.mubr.f32.mxu1 %v3547_v43  ;;  %1925 = vmatprep.mubr.f32.mxu0 %v3547_v43  ;;  %v3381_v38 = vpack.c.bf16 %v247_v32, %v215_v31  ;;  %v502_v31 = vld [vmem:[#allocation7 + $0x9f0] sm:$0xff]  ;;  %v533_v32 = vld [vmem:[#allocation7 + $0xae8] sm:$0xff] }
 0x1d1   :  { %3298 = vmatprep.subr.bf16.mxu1 %v3297_v40  ;;  %3330 = vmatprep.subr.bf16.mxu0 %v3329_v41  ;;  %v214_v40 = vld [vmem:[#allocation7 + $0xf0] sm:$0xff] }
 0x1d2   :  { %1837 = vmatmul.mubr.f32.gmra.mrb[46].mxu1 %v3661_v36  ;;  %1926 = vmatmul.mubr.f32.gmra.mrb[50].mxu0 %v3661_v36  ;;  %v246_v41 = vld [vmem:[#allocation7 + $0x1f0] sm:$0xff] }
 0x1d3   :  { %3300 = vmatpush1.bf16.msra.mxu1 %v3299_v46  ;;  %3332 = vmatpush1.bf16.msra.mxu0 %v3331_v47  ;;  %v311_v46 = vld [vmem:[#allocation7 + $0x3f8] sm:$0xff]  ;;  %v3351_v47 = vpack.c.bf16 %v244_v39, %v212_v35  ;;  %v3383_v48 = vpack.c.bf16 %v246_v41, %v214_v40  ;;  %v3399_v41 = vpack.c.bf16 %v502_v31, %v470_v30 }
 0x1d4   :  { %3302 = vmatprep.subr.bf16.mxu1 %v3301_v50  ;;  %3334 = vmatprep.subr.bf16.mxu0 %v3333_v51  ;;  %v308_v50 = vld [vmem:[#allocation7 + $0x3e0] sm:$0xff]  ;;  %v278_v51 = vld [vmem:[#allocation7 + $0x2f0] sm:$0xff]  ;;  %v3385_v54 = vpack.c.bf16 %v311_v46, %v279_v45  ;;  %v567_v35 = vld [vmem:[#allocation7 + $0xbf8] sm:$0xff] }
 0x1d5   :  { %1996 = vmatprep.mubr.f32.mxu1 %v3547_v43  ;;  %2085 = vmatprep.mubr.f32.mxu0 %v3547_v43  ;;  %v3387_v60 = vpack.c.bf16 %v310_v52, %v278_v51  ;;  %v532_v45 = vld [vmem:[#allocation7 + $0xae0] sm:$0xff]  ;;  %v597_v51 = vld [vmem:[#allocation7 + $0xce8] sm:$0xff] }
 0x1d6   :  { %v564_v46 = vld [vmem:[#allocation7 + $0xbe0] sm:$0xff]  ;;  %v629_v52 = vld [vmem:[#allocation7 + $0xde8] sm:$0xff] }
 0x1d7   :  { %3304 = vmatpush1.bf16.msra.mxu1 %v3303_v58  ;;  %3336 = vmatpush1.bf16.msra.mxu0 %v3335_v59  ;;  %v375_v58 = vld [vmem:[#allocation7 + $0x5f8] sm:$0xff]  ;;  %v3355_v59 = vpack.c.bf16 %v308_v50, %v276_v49  ;;  %v534_v49 = vld [vmem:[#allocation7 + $0xaf0] sm:$0xff] }
 0x1d8   :  { %3306 = vmatprep.subr.bf16.mxu1 %v3305_v63  ;;  %3338 = vmatprep.subr.bf16.mxu0 %v3337_v0  ;;  %v372_v63 = vld [vmem:[#allocation7 + $0x5e0] sm:$0xff]  ;;  %v342_v0 = vld [vmem:[#allocation7 + $0x4f0] sm:$0xff]  ;;  %v3389_v3 = vpack.c.bf16 %v375_v58, %v343_v57 }
 0x1d9   :  { %v3359_v9 = vpack.c.bf16 %v372_v63, %v340_v62  ;;  %v3391_v10 = vpack.c.bf16 %v374_v1, %v342_v0  ;;  %v566_v50 = vld [vmem:[#allocation7 + $0xbf0] sm:$0xff]  ;;  %v596_v62 = vld [vmem:[#allocation7 + $0xce0] sm:$0xff]  ;;  %v3373_v0 = vpack.c.bf16 %v629_v52, %v597_v51 }
 0x1da   :  { %v628_v63 = vld [vmem:[#allocation7 + $0xde0] sm:$0xff] }
 0x1db   :  { %3308 = vmatpush1.bf16.msra.mxu1 %v3307_v7  ;;  %3340 = vmatpush1.bf16.msra.mxu0 %v3339_v8  ;;  %v439_v7 = vld [vmem:[#allocation7 + $0x7f8] sm:$0xff]  ;;  %v704_v8 = vlaneseq }
 0x1dc   :  { %3310 = vmatprep.subr.bf16.mxu1 %v3309_v11  ;;  %3342 = vmatprep.subr.bf16.mxu0 %v3341_v12  ;;  %v404_v11 = vld [vmem:[#allocation7 + $0x6e0] sm:$0xff]  ;;  %v3393_v18 = vpack.c.bf16 %v439_v7, %v407_v6  ;;  %v693_v7 = vld [vmem:[#allocation7 + $0xfe8] sm:$0xff] }
 0x1dd   :  { %v436_v12 = vld [vmem:[#allocation7 + $0x7e0] sm:$0xff]  ;;  %v3761_v22 = vshrl.u32 %v704_v8, 7  ;;  %v663_v8 = vld [vmem:[#allocation7 + $0xef8] sm:$0xff] }
 0x1de   :  { %v3363_v24 = vpack.c.bf16 %v436_v12, %v404_v11 }
 0x1df   :  { %3312 = vmatpush1.bf16.msra.mxu1 %v3311_v20  ;;  %3344 = vmatpush1.bf16.msra.mxu0 %v3343_v21  ;;  %v471_v20 = vld [vmem:[#allocation7 + $0x8f8] sm:$0xff]  ;;  %v3774_v39 = vsub.s32 1, %v3761_v22  ;;  %v3779_v44 = vsub.s32 3, %v3761_v22 }
 0x1e0   :  { %3314 = vmatprep.subr.bf16.mxu1 %v3313_v25  ;;  %3346 = vmatprep.subr.bf16.mxu0 %v3345_v26  ;;  %v503_v21 = vld [vmem:[#allocation7 + $0x9f8] sm:$0xff]  ;;  %v3395_v25 = vpack.c.bf16 %v438_v15, %v406_v14  ;;  %v468_v26 = vld [vmem:[#allocation7 + $0x8e0] sm:$0xff]  ;;  %v3375_v15 = vpack.c.bf16 %v628_v63, %v596_v62 }
 0x1e1   :  { %v3397_v29 = vpack.c.bf16 %v503_v21, %v471_v20  ;;  %v3367_v40 = vpack.c.bf16 %v500_v27, %v468_v26  ;;  %v3793_v57 = vrot.slane %v3776_v42, %v3774_v39  ;;  %v3797_v58 = vrot.slane %v3776_v42, %v3779_v44  ;;  %v692_v20 = vld [vmem:[#allocation7 + $0xfe0] sm:$0xff]  ;;  %v694_v26 = vld [vmem:[#allocation7 + $0xff0] sm:$0xff] }
 0x1e2   :  { %v3377_v21 = vpack.c.bf16 %v693_v7, %v661_v4 }
 0x1e3   :  { %3316 = vmatpush1.bf16.msra.mxu1 %v3315_v33  ;;  %3348 = vmatpush1.bf16.msra.mxu0 %v3347_v34  ;;  %v565_v33 = vld [vmem:[#allocation7 + $0xbe8] sm:$0xff]  ;;  %v535_v34 = vld [vmem:[#allocation7 + $0xaf8] sm:$0xff] }
 0x1e4   :  { %3350 = vmatprep.subr.bf16.mxu1 %v3349_v37  ;;  %3382 = vmatprep.subr.bf16.mxu0 %v3381_v38  ;;  %v3768_v37 = vsub.s32 0, %v3761_v22  ;;  %v3771_v38 = vsub.s32 2, %v3761_v22 }
 0x1e6   :  { %1997 = vmatmul.mubr.f32.vlgmr.msra.gmra.mrb[48].mxu1 %v3647_v61  ;;  %2086 = vmatmul.mubr.f32.vlgmr.msra.gmra.mrb[52].mxu0 %v3647_v61  ;;  %v3785_v55 = vrot.slane %v3776_v42, %v3768_v37  ;;  %v3789_v56 = vrot.slane %v3776_v42, %v3771_v38 }
 0x1e7   :  { %3352 = vmatpush1.bf16.msra.mxu1 %v3351_v47  ;;  %3384 = vmatpush1.bf16.msra.mxu0 %v3383_v48  ;;  %v3369_v47 = vpack.c.bf16 %v565_v33, %v533_v32  ;;  %v3401_v48 = vpack.c.bf16 %v567_v35, %v535_v34  ;;  %v3379_v35 = vpack.c.bf16 %v692_v20, %v660_v19 }
 0x1e8   :  { %2002 = vmatprep.mubr.f32.mxu1 %v3547_v43  ;;  %2091 = vmatprep.mubr.f32.mxu0 %v3547_v43 }
 0x1e9   :  { %3354 = vmatprep.subr.bf16.mxu1 %v3353_v53  ;;  %3386 = vmatprep.subr.bf16.mxu0 %v3385_v54  ;;  %v599_v53 = vld [vmem:[#allocation7 + $0xcf8] sm:$0xff] }
 0x1ea   :  { %2003 = vmatmul.mubr.f32.gmra.mrb[50].mxu1 %v3651_v13  ;;  %2092 = vmatmul.mubr.f32.gmra.mrb[54].mxu0 %v3651_v13  ;;  %v631_v54 = vld [vmem:[#allocation7 + $0xdf8] sm:$0xff] }
 0x1eb   :  { %3356 = vmatpush1.bf16.msra.mxu1 %v3355_v59  ;;  %3388 = vmatpush1.bf16.msra.mxu0 %v3387_v60  ;;  %v3371_v59 = vpack.c.bf16 %v564_v46, %v532_v45  ;;  %v3403_v60 = vpack.c.bf16 %v566_v50, %v534_v49  ;;  %v3405_v1 = vpack.c.bf16 %v631_v54, %v599_v53 }
 0x1ec   :  { %2008 = vmatprep.mubr.f32.mxu1 %v3547_v43  ;;  %2097 = vmatprep.mubr.f32.mxu0 %v3547_v43 }
 0x1ed   :  { %3358 = vmatprep.subr.bf16.mxu1 %v3357_v2  ;;  %3390 = vmatprep.subr.bf16.mxu0 %v3389_v3  ;;  %v598_v2 = vld [vmem:[#allocation7 + $0xcf0] sm:$0xff] }
 0x1ee   :  { %2009 = vmatmul.mubr.f32.gmra.mrb[52].mxu1 %v3657_v23  ;;  %2098 = vmatmul.mubr.f32.gmra.mrb[56].mxu0 %v3657_v23  ;;  %v630_v3 = vld [vmem:[#allocation7 + $0xdf0] sm:$0xff] }
 0x1ef   :  { %3360 = vmatpush1.bf16.msra.mxu1 %v3359_v9  ;;  %3392 = vmatpush1.bf16.msra.mxu0 %v3391_v10  ;;  %v695_v9 = vld [vmem:[#allocation7 + $0xff8] sm:$0xff] }
 0x1f0   :  { %2014 = vmatprep.mubr.f32.mxu1 %v3547_v43  ;;  %2103 = vmatprep.mubr.f32.mxu0 %v3547_v43 }
 0x1f1   :  { %3362 = vmatprep.subr.bf16.mxu1 %v3361_v17  ;;  %3394 = vmatprep.subr.bf16.mxu0 %v3393_v18  ;;  %v3407_v18 = vpack.c.bf16 %v630_v3, %v598_v2 }
 0x1f2   :  { %2015 = vmatmul.mubr.f32.gmra.mrb[54].mxu1 %v3661_v36  ;;  %2104 = vmatmul.mubr.f32.gmra.mrb[58].mxu0 %v3661_v36 }
 0x1f3   :  { %3364 = vmatpush1.bf16.msra.mxu1 %v3363_v24  ;;  %3396 = vmatpush1.bf16.msra.mxu0 %v3395_v25  ;;  %v3409_v24 = vpack.c.bf16 %v695_v9, %v663_v8  ;;  %v662_v25 = vld [vmem:[#allocation7 + $0xef0] sm:$0xff] }
 0x1f4   :  { %3366 = vmatprep.subr.bf16.mxu1 %v3365_v28  ;;  %3398 = vmatprep.subr.bf16.mxu0 %v3397_v29  ;;  %v3411_v45 = vpack.c.bf16 %v694_v26, %v662_v25 }
 0x1f5   :  { %2174 = vmatprep.mubr.f32.mxu1 %v3547_v43  ;;  %2263 = vmatprep.mubr.f32.mxu0 %v3547_v43 }
 0x1f7   :  { %3368 = vmatpush1.bf16.msra.mxu1 %v3367_v40  ;;  %3400 = vmatpush1.bf16.msra.mxu0 %v3399_v41 }
 0x1f8   :  { %3370 = vmatprep.subr.bf16.mxu1 %v3369_v47  ;;  %3402 = vmatprep.subr.bf16.mxu0 %v3401_v48 }
 0x1f9   :  { %v930_v5 = vpop.f32.mrb[0].mxu1  ;;  %v1019_v6 = vpop.f32.mrb[4].mxu0 }
 0x1fa   :  { %v931_v10 = vadd.f32 %v930_v5, %v3785_v55  ;;  %v1020_v11 = vadd.f32 %v1019_v6, %v3789_v56  ;;  %v932_v12 = vpop.f32.mrb[1].mxu1  ;;  %v1021_v14 = vpop.f32.mrb[5].mxu0 }
 0x1fb   :  { %v933_v16 = vadd.f32 %v932_v12, %v3793_v57  ;;  %v1022_v17 = vadd.f32 %v1021_v14, %v3797_v58  ;;  %3372 = vmatpush1.bf16.msra.mxu1 %v3371_v59  ;;  %3404 = vmatpush1.bf16.msra.mxu0 %v3403_v60 }
 0x1fc   :  { %3374 = vmatprep.subr.bf16.mxu1 %v3373_v0  ;;  %3406 = vmatprep.subr.bf16.mxu0 %v3405_v1 }
 0x1fd   :  { %v2824_v27 = vpack.c.bf16 %v933_v16, %v931_v10  ;;  %v2825_v28 = vpack.c.bf16 %v1022_v17, %v1020_v11  ;;  %v936_v29 = vpop.f32.mrb[2].mxu1  ;;  %v1025_v30 = vpop.f32.mrb[6].mxu0 }
 0x1fe   :  { %v937_v31 = vadd.f32 %v936_v29, %v3785_v55  ;;  %v1026_v32 = vadd.f32 %v1025_v30, %v3789_v56  ;;  %v938_v33 = vpop.f32.mrb[3].mxu1  ;;  %v1027_v34 = vpop.f32.mrb[7].mxu0 }
 0x1ff   :  { %2672 = vst [vmem:[#allocation10] sm:$0xff] %v2824_v27  ;;  %2673 = vst [vmem:[#allocation10 + $0x8] sm:$0xff] %v2825_v28  ;;  %v939_v40 = vadd.f32 %v938_v33, %v3793_v57  ;;  %v1028_v41 = vadd.f32 %v1027_v34, %v3797_v58  ;;  %3376 = vmatpush1.bf16.msra.mxu1 %v3375_v15  ;;  %3408 = vmatpush1.bf16.msra.mxu0 %v3407_v18 }
 0x200   :  { %3378 = vmatprep.subr.bf16.mxu1 %v3377_v21  ;;  %3410 = vmatprep.subr.bf16.mxu0 %v3409_v24 }
 0x201   :  { %v2840_v46 = vpack.c.bf16 %v939_v40, %v937_v31  ;;  %v2841_v47 = vpack.c.bf16 %v1028_v41, %v1026_v32  ;;  %v942_v48 = vpop.f32.mrb[4].mxu1  ;;  %v1031_v49 = vpop.f32.mrb[8].mxu0 }
 0x202   :  { %v943_v50 = vadd.f32 %v942_v48, %v3785_v55  ;;  %v1032_v51 = vadd.f32 %v1031_v49, %v3789_v56  ;;  %v944_v52 = vpop.f32.mrb[5].mxu1  ;;  %v1033_v53 = vpop.f32.mrb[9].mxu0 }
 0x203   :  { %2688 = vst [vmem:[#allocation10 + $0x80] sm:$0xff] %v2840_v46  ;;  %2689 = vst [vmem:[#allocation10 + $0x88] sm:$0xff] %v2841_v47  ;;  %3380 = vmatpush1.bf16.msra.mxu1 %v3379_v35  ;;  %3412 = vmatpush1.bf16.msra.mxu0 %v3411_v45  ;;  %v945_v54 = vadd.f32 %v944_v52, %v3793_v57  ;;  %v1034_v59 = vadd.f32 %v1033_v53, %v3797_v58 }
 0x205   :  { %v2856_v60 = vpack.c.bf16 %v945_v54, %v943_v50  ;;  %v2857_v62 = vpack.c.bf16 %v1034_v59, %v1032_v51  ;;  %v948_v63 = vpop.f32.mrb[6].mxu1  ;;  %v1037_v0 = vpop.f32.mrb[10].mxu0 }
 0x206   :  { %2175 = vmatmul.mubr.f32.vlgmr.msra.gmra.mrb[56].mxu1 %v3647_v61  ;;  %2264 = vmatmul.mubr.f32.vlgmr.msra.gmra.mrb[60].mxu0 %v3647_v61  ;;  %v949_v1 = vadd.f32 %v948_v63, %v3785_v55  ;;  %v1038_v2 = vadd.f32 %v1037_v0, %v3789_v56  ;;  %v950_v3 = vpop.f32.mrb[7].mxu1  ;;  %v1039_v4 = vpop.f32.mrb[11].mxu0  ;;  %v3830_v61 = vsub.s32 4, %v3761_v22  ;;  %v3836_v55 = vsub.s32 5, %v3761_v22 }
 0x207   :  { %2180 = vmatprep.mubr.f32.mxu1 %v3547_v43  ;;  %2269 = vmatprep.mubr.f32.mxu0 %v3547_v43  ;;  %2704 = vst [vmem:[#allocation10 + $0x100] sm:$0xff] %v2856_v60  ;;  %2705 = vst [vmem:[#allocation10 + $0x108] sm:$0xff] %v2857_v62  ;;  %v951_v5 = vadd.f32 %v950_v3, %v3793_v57  ;;  %v1040_v6 = vadd.f32 %v1039_v4, %v3797_v58  ;;  %v3839_v56 = vsub.s32 7, %v3761_v22  ;;  %v697_v60 = vld [vmem:[#allocation8 + $0x8] sm:$0xff] }
 0x208   :  { %v739_v62 = vrot.slane %v697_v60, %v3768_v37  ;;  %v747_v63 = vrot.slane %v697_v60, %v3771_v38  ;;  %v743_v0 = vrot.slane %v697_v60, %v3774_v39 }
 0x209   :  { %v2872_v7 = vpack.c.bf16 %v951_v5, %v949_v1  ;;  %v2873_v8 = vpack.c.bf16 %v1040_v6, %v1038_v2  ;;  %v735_v57 = vrot.slane %v3776_v42, %v3839_v56  ;;  %v751_v1 = vrot.slane %v697_v60, %v3779_v44 }
 0x20a   :  { %2181 = vmatmul.mubr.f32.gmra.mrb[58].mxu1 %v3651_v13  ;;  %2270 = vmatmul.mubr.f32.gmra.mrb[62].mxu0 %v3651_v13  ;;  %v3833_v13 = vsub.s32 6, %v3761_v22 }
 0x20b   :  { %2186 = vmatprep.mubr.f32.mxu1 %v3547_v43  ;;  %2275 = vmatprep.mubr.f32.mxu0 %v3547_v43  ;;  %2720 = vst [vmem:[#allocation10 + $0x180] sm:$0xff] %v2872_v7  ;;  %2721 = vst [vmem:[#allocation10 + $0x188] sm:$0xff] %v2873_v8 }
 0x20e   :  { %2187 = vmatmul.mubr.f32.gmra.mrb[60].mxu1 %v3657_v23  ;;  %2276 = vmatmul.mubr.f32.gmra.mrb[64].mxu0 %v3657_v23  ;;  %v723_v23 = vrot.slane %v3776_v42, %v3830_v61 }
 0x20f   :  { %2192 = vmatprep.mubr.f32.mxu1 %v3547_v43  ;;  %2281 = vmatprep.mubr.f32.mxu0 %v3547_v43  ;;  %v731_v43 = vrot.slane %v3776_v42, %v3833_v13 }
 0x212   :  { %2193 = vmatmul.mubr.f32.gmra.mrb[62].mxu1 %v3661_v36  ;;  %2282 = vmatmul.mubr.f32.gmra.mrb[66].mxu0 %v3661_v36  ;;  %v727_v36 = vrot.slane %v3776_v42, %v3836_v55 }
 0x219   :  { %v1108_v58 = vpop.f32.mrb[8].mxu1  ;;  %v1197_v9 = vpop.f32.mrb[12].mxu0 }
 0x21a   :  { %v1109_v10 = vadd.f32 %v1108_v58, %v723_v23  ;;  %v1198_v11 = vadd.f32 %v1197_v9, %v731_v43  ;;  %v1110_v12 = vpop.f32.mrb[9].mxu1  ;;  %v1199_v14 = vpop.f32.mrb[13].mxu0 }
 0x21b   :  { %v1111_v22 = vadd.f32 %v1110_v12, %v727_v36  ;;  %v1200_v15 = vadd.f32 %v1199_v14, %v735_v57 }
 0x21d   :  { %v2826_v16 = vpack.c.bf16 %v1111_v22, %v1109_v10  ;;  %v2827_v17 = vpack.c.bf16 %v1200_v15, %v1198_v11  ;;  %v1114_v18 = vpop.f32.mrb[10].mxu1  ;;  %v1203_v19 = vpop.f32.mrb[14].mxu0 }
 0x21e   :  { %v1115_v20 = vadd.f32 %v1114_v18, %v723_v23  ;;  %v1204_v21 = vadd.f32 %v1203_v19, %v731_v43  ;;  %v1116_v24 = vpop.f32.mrb[11].mxu1  ;;  %v1205_v25 = vpop.f32.mrb[15].mxu0 }
 0x21f   :  { %2674 = vst [vmem:[#allocation10 + $0x10] sm:$0xff] %v2826_v16  ;;  %2675 = vst [vmem:[#allocation10 + $0x18] sm:$0xff] %v2827_v17  ;;  %v1117_v26 = vadd.f32 %v1116_v24, %v727_v36  ;;  %v1206_v42 = vadd.f32 %v1205_v25, %v735_v57 }
 0x221   :  { %v2842_v27 = vpack.c.bf16 %v1117_v26, %v1115_v20  ;;  %v2843_v28 = vpack.c.bf16 %v1206_v42, %v1204_v21  ;;  %v1120_v29 = vpop.f32.mrb[12].mxu1  ;;  %v1209_v30 = vpop.f32.mrb[16].mxu0 }
 0x222   :  { %v1121_v31 = vadd.f32 %v1120_v29, %v723_v23  ;;  %v1210_v32 = vadd.f32 %v1209_v30, %v731_v43  ;;  %v1122_v33 = vpop.f32.mrb[13].mxu1  ;;  %v1211_v34 = vpop.f32.mrb[17].mxu0 }
 0x223   :  { %2690 = vst [vmem:[#allocation10 + $0x90] sm:$0xff] %v2842_v27  ;;  %2691 = vst [vmem:[#allocation10 + $0x98] sm:$0xff] %v2843_v28  ;;  %v1123_v35 = vadd.f32 %v1122_v33, %v727_v36  ;;  %v1212_v40 = vadd.f32 %v1211_v34, %v735_v57 }
 0x225   :  { %v2858_v41 = vpack.c.bf16 %v1123_v35, %v1121_v31  ;;  %v2859_v45 = vpack.c.bf16 %v1212_v40, %v1210_v32  ;;  %v1126_v46 = vpop.f32.mrb[14].mxu1  ;;  %v1215_v47 = vpop.f32.mrb[18].mxu0 }
 0x226   :  { %v1127_v48 = vadd.f32 %v1126_v46, %v723_v23  ;;  %v1216_v49 = vadd.f32 %v1215_v47, %v731_v43  ;;  %v1128_v50 = vpop.f32.mrb[15].mxu1  ;;  %v1217_v51 = vpop.f32.mrb[19].mxu0  ;;  %v763_v46 = vrot.slane %v697_v60, %v3833_v13  ;;  %v759_v47 = vrot.slane %v697_v60, %v3836_v55 }
 0x227   :  { %2706 = vst [vmem:[#allocation10 + $0x110] sm:$0xff] %v2858_v41  ;;  %2707 = vst [vmem:[#allocation10 + $0x118] sm:$0xff] %v2859_v45  ;;  %v1129_v52 = vadd.f32 %v1128_v50, %v727_v36  ;;  %v1218_v53 = vadd.f32 %v1217_v51, %v735_v57  ;;  %v755_v45 = vrot.slane %v697_v60, %v3830_v61 }
 0x229   :  { %v2874_v54 = vpack.c.bf16 %v1129_v52, %v1127_v48  ;;  %v2875_v59 = vpack.c.bf16 %v1218_v53, %v1216_v49  ;;  %v767_v48 = vrot.slane %v697_v60, %v3839_v56 }
 0x22b   :  { %2722 = vst [vmem:[#allocation10 + $0x190] sm:$0xff] %v2874_v54  ;;  %2723 = vst [vmem:[#allocation10 + $0x198] sm:$0xff] %v2875_v59 }
 0x239   :  { %v1286_v2 = vpop.f32.mrb[16].mxu1  ;;  %v1375_v3 = vpop.f32.mrb[20].mxu0 }
 0x23a   :  { %v1287_v4 = vadd.f32 %v1286_v2, %v739_v62  ;;  %v1376_v5 = vadd.f32 %v1375_v3, %v747_v63  ;;  %v1288_v6 = vpop.f32.mrb[17].mxu1  ;;  %v1377_v7 = vpop.f32.mrb[21].mxu0 }
 0x23b   :  { %v1289_v8 = vadd.f32 %v1288_v6, %v743_v0  ;;  %v1378_v23 = vadd.f32 %v1377_v7, %v751_v1 }
 0x23d   :  { %v2828_v43 = vpack.c.bf16 %v1289_v8, %v1287_v4  ;;  %v2829_v36 = vpack.c.bf16 %v1378_v23, %v1376_v5  ;;  %v1292_v57 = vpop.f32.mrb[18].mxu1  ;;  %v1381_v58 = vpop.f32.mrb[22].mxu0 }
 0x23e   :  { %v1293_v9 = vadd.f32 %v1292_v57, %v739_v62  ;;  %v1382_v10 = vadd.f32 %v1381_v58, %v747_v63  ;;  %v1294_v11 = vpop.f32.mrb[19].mxu1  ;;  %v1383_v12 = vpop.f32.mrb[23].mxu0 }
 0x23f   :  { %2676 = vst [vmem:[#allocation10 + $0x20] sm:$0xff] %v2828_v43  ;;  %2677 = vst [vmem:[#allocation10 + $0x28] sm:$0xff] %v2829_v36  ;;  %v1295_v14 = vadd.f32 %v1294_v11, %v743_v0  ;;  %v1384_v22 = vadd.f32 %v1383_v12, %v751_v1 }
 0x241   :  { %v2844_v15 = vpack.c.bf16 %v1295_v14, %v1293_v9  ;;  %v2845_v16 = vpack.c.bf16 %v1384_v22, %v1382_v10  ;;  %v1298_v17 = vpop.f32.mrb[20].mxu1  ;;  %v1387_v18 = vpop.f32.mrb[24].mxu0 }
 0x242   :  { %v1299_v19 = vadd.f32 %v1298_v17, %v739_v62  ;;  %v1388_v20 = vadd.f32 %v1387_v18, %v747_v63  ;;  %v1300_v21 = vpop.f32.mrb[21].mxu1  ;;  %v1389_v24 = vpop.f32.mrb[25].mxu0 }
 0x243   :  { %2692 = vst [vmem:[#allocation10 + $0xa0] sm:$0xff] %v2844_v15  ;;  %2693 = vst [vmem:[#allocation10 + $0xa8] sm:$0xff] %v2845_v16  ;;  %v1301_v25 = vadd.f32 %v1300_v21, %v743_v0  ;;  %v1390_v26 = vadd.f32 %v1389_v24, %v751_v1 }
 0x245   :  { %v2860_v42 = vpack.c.bf16 %v1301_v25, %v1299_v19  ;;  %v2861_v27 = vpack.c.bf16 %v1390_v26, %v1388_v20  ;;  %v1304_v28 = vpop.f32.mrb[22].mxu1  ;;  %v1393_v29 = vpop.f32.mrb[26].mxu0 }
 0x246   :  { %v1305_v30 = vadd.f32 %v1304_v28, %v739_v62  ;;  %v1394_v31 = vadd.f32 %v1393_v29, %v747_v63  ;;  %v1306_v32 = vpop.f32.mrb[23].mxu1  ;;  %v1395_v33 = vpop.f32.mrb[27].mxu0 }
 0x247   :  { %2708 = vst [vmem:[#allocation10 + $0x120] sm:$0xff] %v2860_v42  ;;  %2709 = vst [vmem:[#allocation10 + $0x128] sm:$0xff] %v2861_v27  ;;  %v1307_v34 = vadd.f32 %v1306_v32, %v743_v0  ;;  %v1396_v35 = vadd.f32 %v1395_v33, %v751_v1  ;;  %v698_v42 = vld [vmem:[#allocation8 + $0x10] sm:$0xff] }
 0x248   :  { %v771_v27 = vrot.slane %v698_v42, %v3768_v37  ;;  %v779_v28 = vrot.slane %v698_v42, %v3771_v38  ;;  %v775_v29 = vrot.slane %v698_v42, %v3774_v39 }
 0x249   :  { %v2876_v40 = vpack.c.bf16 %v1307_v34, %v1305_v30  ;;  %v2877_v41 = vpack.c.bf16 %v1396_v35, %v1394_v31  ;;  %v783_v30 = vrot.slane %v698_v42, %v3779_v44 }
 0x24b   :  { %2724 = vst [vmem:[#allocation10 + $0x1a0] sm:$0xff] %v2876_v40  ;;  %2725 = vst [vmem:[#allocation10 + $0x1a8] sm:$0xff] %v2877_v41 }
 0x259   :  { %v1464_v49 = vpop.f32.mrb[24].mxu1  ;;  %v1553_v50 = vpop.f32.mrb[28].mxu0 }
 0x25a   :  { %v1465_v51 = vadd.f32 %v1464_v49, %v755_v45  ;;  %v1554_v52 = vadd.f32 %v1553_v50, %v763_v46  ;;  %v1466_v53 = vpop.f32.mrb[25].mxu1  ;;  %v1555_v54 = vpop.f32.mrb[29].mxu0 }
 0x25b   :  { %v1467_v59 = vadd.f32 %v1466_v53, %v759_v47  ;;  %v1556_v62 = vadd.f32 %v1555_v54, %v767_v48 }
 0x25d   :  { %v2830_v63 = vpack.c.bf16 %v1467_v59, %v1465_v51  ;;  %v2831_v0 = vpack.c.bf16 %v1556_v62, %v1554_v52  ;;  %v1470_v1 = vpop.f32.mrb[26].mxu1  ;;  %v1559_v2 = vpop.f32.mrb[30].mxu0 }
 0x25e   :  { %v1471_v3 = vadd.f32 %v1470_v1, %v755_v45  ;;  %v1560_v4 = vadd.f32 %v1559_v2, %v763_v46  ;;  %v1472_v5 = vpop.f32.mrb[27].mxu1  ;;  %v1561_v6 = vpop.f32.mrb[31].mxu0 }
 0x25f   :  { %2678 = vst [vmem:[#allocation10 + $0x30] sm:$0xff] %v2830_v63  ;;  %2679 = vst [vmem:[#allocation10 + $0x38] sm:$0xff] %v2831_v0  ;;  %v1473_v7 = vadd.f32 %v1472_v5, %v759_v47  ;;  %v1562_v60 = vadd.f32 %v1561_v6, %v767_v48 }
 0x261   :  { %v2846_v8 = vpack.c.bf16 %v1473_v7, %v1471_v3  ;;  %v2847_v23 = vpack.c.bf16 %v1562_v60, %v1560_v4  ;;  %v1476_v43 = vpop.f32.mrb[28].mxu1  ;;  %v1565_v36 = vpop.f32.mrb[32].mxu0 }
 0x262   :  { %v1477_v57 = vadd.f32 %v1476_v43, %v755_v45  ;;  %v1566_v58 = vadd.f32 %v1565_v36, %v763_v46  ;;  %v1478_v9 = vpop.f32.mrb[29].mxu1  ;;  %v1567_v10 = vpop.f32.mrb[33].mxu0 }
 0x263   :  { %2694 = vst [vmem:[#allocation10 + $0xb0] sm:$0xff] %v2846_v8  ;;  %2695 = vst [vmem:[#allocation10 + $0xb8] sm:$0xff] %v2847_v23  ;;  %v1479_v11 = vadd.f32 %v1478_v9, %v759_v47  ;;  %v1568_v12 = vadd.f32 %v1567_v10, %v767_v48 }
 0x265   :  { %v2862_v14 = vpack.c.bf16 %v1479_v11, %v1477_v57  ;;  %v2863_v22 = vpack.c.bf16 %v1568_v12, %v1566_v58  ;;  %v1482_v15 = vpop.f32.mrb[30].mxu1  ;;  %v1571_v16 = vpop.f32.mrb[34].mxu0 }
 0x266   :  { %v1483_v17 = vadd.f32 %v1482_v15, %v755_v45  ;;  %v1572_v18 = vadd.f32 %v1571_v16, %v763_v46  ;;  %v1484_v19 = vpop.f32.mrb[31].mxu1  ;;  %v1573_v20 = vpop.f32.mrb[35].mxu0  ;;  %v795_v15 = vrot.slane %v698_v42, %v3833_v13  ;;  %v791_v16 = vrot.slane %v698_v42, %v3836_v55 }
 0x267   :  { %2710 = vst [vmem:[#allocation10 + $0x130] sm:$0xff] %v2862_v14  ;;  %2711 = vst [vmem:[#allocation10 + $0x138] sm:$0xff] %v2863_v22  ;;  %v1485_v21 = vadd.f32 %v1484_v19, %v759_v47  ;;  %v1574_v24 = vadd.f32 %v1573_v20, %v767_v48  ;;  %v787_v22 = vrot.slane %v698_v42, %v3830_v61 }
 0x269   :  { %v2878_v25 = vpack.c.bf16 %v1485_v21, %v1483_v17  ;;  %v2879_v26 = vpack.c.bf16 %v1574_v24, %v1572_v18  ;;  %v799_v17 = vrot.slane %v698_v42, %v3839_v56 }
 0x26b   :  { %2726 = vst [vmem:[#allocation10 + $0x1b0] sm:$0xff] %v2878_v25  ;;  %2727 = vst [vmem:[#allocation10 + $0x1b8] sm:$0xff] %v2879_v26 }
 0x279   :  { %v1642_v31 = vpop.f32.mrb[32].mxu1  ;;  %v1731_v32 = vpop.f32.mrb[36].mxu0 }
 0x27a   :  { %v1643_v33 = vadd.f32 %v1642_v31, %v771_v27  ;;  %v1732_v34 = vadd.f32 %v1731_v32, %v779_v28  ;;  %v1644_v35 = vpop.f32.mrb[33].mxu1  ;;  %v1733_v40 = vpop.f32.mrb[37].mxu0 }
 0x27b   :  { %v1645_v41 = vadd.f32 %v1644_v35, %v775_v29  ;;  %v1734_v45 = vadd.f32 %v1733_v40, %v783_v30 }
 0x27d   :  { %v2832_v46 = vpack.c.bf16 %v1645_v41, %v1643_v33  ;;  %v2833_v47 = vpack.c.bf16 %v1734_v45, %v1732_v34  ;;  %v1648_v48 = vpop.f32.mrb[34].mxu1  ;;  %v1737_v49 = vpop.f32.mrb[38].mxu0 }
 0x27e   :  { %v1649_v50 = vadd.f32 %v1648_v48, %v771_v27  ;;  %v1738_v51 = vadd.f32 %v1737_v49, %v779_v28  ;;  %v1650_v52 = vpop.f32.mrb[35].mxu1  ;;  %v1739_v53 = vpop.f32.mrb[39].mxu0 }
 0x27f   :  { %2680 = vst [vmem:[#allocation10 + $0x40] sm:$0xff] %v2832_v46  ;;  %2681 = vst [vmem:[#allocation10 + $0x48] sm:$0xff] %v2833_v47  ;;  %v1651_v54 = vadd.f32 %v1650_v52, %v775_v29  ;;  %v1740_v59 = vadd.f32 %v1739_v53, %v783_v30 }
 0x281   :  { %v2848_v62 = vpack.c.bf16 %v1651_v54, %v1649_v50  ;;  %v2849_v63 = vpack.c.bf16 %v1740_v59, %v1738_v51  ;;  %v1654_v0 = vpop.f32.mrb[36].mxu1  ;;  %v1743_v1 = vpop.f32.mrb[40].mxu0 }
 0x282   :  { %v1655_v2 = vadd.f32 %v1654_v0, %v771_v27  ;;  %v1744_v3 = vadd.f32 %v1743_v1, %v779_v28  ;;  %v1656_v4 = vpop.f32.mrb[37].mxu1  ;;  %v1745_v5 = vpop.f32.mrb[41].mxu0 }
 0x283   :  { %2696 = vst [vmem:[#allocation10 + $0xc0] sm:$0xff] %v2848_v62  ;;  %2697 = vst [vmem:[#allocation10 + $0xc8] sm:$0xff] %v2849_v63  ;;  %v1657_v6 = vadd.f32 %v1656_v4, %v775_v29  ;;  %v1746_v7 = vadd.f32 %v1745_v5, %v783_v30 }
 0x285   :  { %v2864_v60 = vpack.c.bf16 %v1657_v6, %v1655_v2  ;;  %v2865_v8 = vpack.c.bf16 %v1746_v7, %v1744_v3  ;;  %v1660_v23 = vpop.f32.mrb[38].mxu1  ;;  %v1749_v43 = vpop.f32.mrb[42].mxu0 }
 0x286   :  { %v1661_v36 = vadd.f32 %v1660_v23, %v771_v27  ;;  %v1750_v57 = vadd.f32 %v1749_v43, %v779_v28  ;;  %v1662_v58 = vpop.f32.mrb[39].mxu1  ;;  %v1751_v9 = vpop.f32.mrb[43].mxu0 }
 0x287   :  { %2712 = vst [vmem:[#allocation10 + $0x140] sm:$0xff] %v2864_v60  ;;  %2713 = vst [vmem:[#allocation10 + $0x148] sm:$0xff] %v2865_v8  ;;  %v1663_v10 = vadd.f32 %v1662_v58, %v775_v29  ;;  %v1752_v11 = vadd.f32 %v1751_v9, %v783_v30  ;;  %v699_v60 = vld [vmem:[#allocation8 + $0x18] sm:$0xff] }
 0x288   :  { %v803_v8 = vrot.slane %v699_v60, %v3768_v37  ;;  %v811_v23 = vrot.slane %v699_v60, %v3771_v38  ;;  %v807_v43 = vrot.slane %v699_v60, %v3774_v39 }
 0x289   :  { %v2880_v12 = vpack.c.bf16 %v1663_v10, %v1661_v36  ;;  %v2881_v14 = vpack.c.bf16 %v1752_v11, %v1750_v57  ;;  %v815_v36 = vrot.slane %v699_v60, %v3779_v44 }
 0x28b   :  { %2728 = vst [vmem:[#allocation10 + $0x1c0] sm:$0xff] %v2880_v12  ;;  %2729 = vst [vmem:[#allocation10 + $0x1c8] sm:$0xff] %v2881_v14 }
 0x299   :  { %v1820_v18 = vpop.f32.mrb[40].mxu1  ;;  %v1909_v19 = vpop.f32.mrb[44].mxu0 }
 0x29a   :  { %v1821_v20 = vadd.f32 %v1820_v18, %v787_v22  ;;  %v1910_v21 = vadd.f32 %v1909_v19, %v795_v15  ;;  %v1822_v24 = vpop.f32.mrb[41].mxu1  ;;  %v1911_v25 = vpop.f32.mrb[45].mxu0 }
 0x29b   :  { %v1823_v26 = vadd.f32 %v1822_v24, %v791_v16  ;;  %v1912_v27 = vadd.f32 %v1911_v25, %v799_v17 }
 0x29d   :  { %v2834_v28 = vpack.c.bf16 %v1823_v26, %v1821_v20  ;;  %v2835_v29 = vpack.c.bf16 %v1912_v27, %v1910_v21  ;;  %v1826_v30 = vpop.f32.mrb[42].mxu1  ;;  %v1915_v31 = vpop.f32.mrb[46].mxu0 }
 0x29e   :  { %v1827_v32 = vadd.f32 %v1826_v30, %v787_v22  ;;  %v1916_v33 = vadd.f32 %v1915_v31, %v795_v15  ;;  %v1828_v34 = vpop.f32.mrb[43].mxu1  ;;  %v1917_v35 = vpop.f32.mrb[47].mxu0 }
 0x29f   :  { %2682 = vst [vmem:[#allocation10 + $0x50] sm:$0xff] %v2834_v28  ;;  %2683 = vst [vmem:[#allocation10 + $0x58] sm:$0xff] %v2835_v29  ;;  %v1829_v40 = vadd.f32 %v1828_v34, %v791_v16  ;;  %v1918_v42 = vadd.f32 %v1917_v35, %v799_v17 }
 0x2a1   :  { %v2850_v41 = vpack.c.bf16 %v1829_v40, %v1827_v32  ;;  %v2851_v45 = vpack.c.bf16 %v1918_v42, %v1916_v33  ;;  %v1832_v46 = vpop.f32.mrb[44].mxu1  ;;  %v1921_v47 = vpop.f32.mrb[48].mxu0 }
 0x2a2   :  { %v1833_v48 = vadd.f32 %v1832_v46, %v787_v22  ;;  %v1922_v49 = vadd.f32 %v1921_v47, %v795_v15  ;;  %v1834_v50 = vpop.f32.mrb[45].mxu1  ;;  %v1923_v51 = vpop.f32.mrb[49].mxu0 }
 0x2a3   :  { %2698 = vst [vmem:[#allocation10 + $0xd0] sm:$0xff] %v2850_v41  ;;  %2699 = vst [vmem:[#allocation10 + $0xd8] sm:$0xff] %v2851_v45  ;;  %v1835_v52 = vadd.f32 %v1834_v50, %v791_v16  ;;  %v1924_v53 = vadd.f32 %v1923_v51, %v799_v17  ;;  %v819_v51 = vrot.slane %v699_v60, %v3830_v61 }
 0x2a5   :  { %v2866_v54 = vpack.c.bf16 %v1835_v52, %v1833_v48  ;;  %v2867_v59 = vpack.c.bf16 %v1924_v53, %v1922_v49  ;;  %v1838_v62 = vpop.f32.mrb[46].mxu1  ;;  %v1927_v63 = vpop.f32.mrb[50].mxu0  ;;  %v827_v52 = vrot.slane %v699_v60, %v3833_v13  ;;  %v823_v53 = vrot.slane %v699_v60, %v3836_v55 }
 0x2a6   :  { %v1839_v0 = vadd.f32 %v1838_v62, %v787_v22  ;;  %v1928_v1 = vadd.f32 %v1927_v63, %v795_v15  ;;  %v1840_v2 = vpop.f32.mrb[47].mxu1  ;;  %v1929_v3 = vpop.f32.mrb[51].mxu0 }
 0x2a7   :  { %2714 = vst [vmem:[#allocation10 + $0x150] sm:$0xff] %v2866_v54  ;;  %2715 = vst [vmem:[#allocation10 + $0x158] sm:$0xff] %v2867_v59  ;;  %v1841_v4 = vadd.f32 %v1840_v2, %v791_v16  ;;  %v1930_v5 = vadd.f32 %v1929_v3, %v799_v17  ;;  %v831_v54 = vrot.slane %v699_v60, %v3839_v56 }
 0x2a9   :  { %v2882_v6 = vpack.c.bf16 %v1841_v4, %v1839_v0  ;;  %v2883_v7 = vpack.c.bf16 %v1930_v5, %v1928_v1 }
 0x2ab   :  { %2730 = vst [vmem:[#allocation10 + $0x1d0] sm:$0xff] %v2882_v6  ;;  %2731 = vst [vmem:[#allocation10 + $0x1d8] sm:$0xff] %v2883_v7 }
 0x2b9   :  { %v1998_v57 = vpop.f32.mrb[48].mxu1  ;;  %v2087_v58 = vpop.f32.mrb[52].mxu0 }
 0x2ba   :  { %v1999_v9 = vadd.f32 %v1998_v57, %v803_v8  ;;  %v2088_v10 = vadd.f32 %v2087_v58, %v811_v23  ;;  %v2000_v11 = vpop.f32.mrb[49].mxu1  ;;  %v2089_v12 = vpop.f32.mrb[53].mxu0 }
 0x2bb   :  { %v2001_v14 = vadd.f32 %v2000_v11, %v807_v43  ;;  %v2090_v22 = vadd.f32 %v2089_v12, %v815_v36 }
 0x2bd   :  { %v2836_v15 = vpack.c.bf16 %v2001_v14, %v1999_v9  ;;  %v2837_v16 = vpack.c.bf16 %v2090_v22, %v2088_v10  ;;  %v2004_v17 = vpop.f32.mrb[50].mxu1  ;;  %v2093_v18 = vpop.f32.mrb[54].mxu0 }
 0x2be   :  { %v2005_v19 = vadd.f32 %v2004_v17, %v803_v8  ;;  %v2094_v37 = vadd.f32 %v2093_v18, %v811_v23  ;;  %v2006_v20 = vpop.f32.mrb[51].mxu1  ;;  %v2095_v38 = vpop.f32.mrb[55].mxu0 }
 0x2bf   :  { %2684 = vst [vmem:[#allocation10 + $0x60] sm:$0xff] %v2836_v15  ;;  %2685 = vst [vmem:[#allocation10 + $0x68] sm:$0xff] %v2837_v16  ;;  %v2007_v39 = vadd.f32 %v2006_v20, %v807_v43  ;;  %v2096_v44 = vadd.f32 %v2095_v38, %v815_v36 }
 0x2c1   :  { %v2852_v21 = vpack.c.bf16 %v2007_v39, %v2005_v19  ;;  %v2853_v24 = vpack.c.bf16 %v2096_v44, %v2094_v37  ;;  %v2010_v25 = vpop.f32.mrb[52].mxu1  ;;  %v2099_v26 = vpop.f32.mrb[56].mxu0 }
 0x2c2   :  { %v2011_v27 = vadd.f32 %v2010_v25, %v803_v8  ;;  %v2100_v28 = vadd.f32 %v2099_v26, %v811_v23  ;;  %v2012_v29 = vpop.f32.mrb[53].mxu1  ;;  %v2101_v30 = vpop.f32.mrb[57].mxu0 }
 0x2c3   :  { %2700 = vst [vmem:[#allocation10 + $0xe0] sm:$0xff] %v2852_v21  ;;  %2701 = vst [vmem:[#allocation10 + $0xe8] sm:$0xff] %v2853_v24  ;;  %v2013_v31 = vadd.f32 %v2012_v29, %v807_v43  ;;  %v2102_v32 = vadd.f32 %v2101_v30, %v815_v36 }
 0x2c5   :  { %v2868_v33 = vpack.c.bf16 %v2013_v31, %v2011_v27  ;;  %v2869_v34 = vpack.c.bf16 %v2102_v32, %v2100_v28  ;;  %v2016_v35 = vpop.f32.mrb[54].mxu1  ;;  %v2105_v40 = vpop.f32.mrb[58].mxu0 }
 0x2c6   :  { %v2017_v42 = vadd.f32 %v2016_v35, %v803_v8  ;;  %v2106_v41 = vadd.f32 %v2105_v40, %v811_v23  ;;  %v2018_v45 = vpop.f32.mrb[55].mxu1  ;;  %v2107_v46 = vpop.f32.mrb[59].mxu0 }
 0x2c7   :  { %2716 = vst [vmem:[#allocation10 + $0x160] sm:$0xff] %v2868_v33  ;;  %2717 = vst [vmem:[#allocation10 + $0x168] sm:$0xff] %v2869_v34  ;;  %v2019_v47 = vadd.f32 %v2018_v45, %v807_v43  ;;  %v2108_v48 = vadd.f32 %v2107_v46, %v815_v36 }
 0x2c9   :  { %v2884_v49 = vpack.c.bf16 %v2019_v47, %v2017_v42  ;;  %v2885_v50 = vpack.c.bf16 %v2108_v48, %v2106_v41 }
 0x2cb   :  { %2732 = vst [vmem:[#allocation10 + $0x1e0] sm:$0xff] %v2884_v49  ;;  %2733 = vst [vmem:[#allocation10 + $0x1e8] sm:$0xff] %v2885_v50 }
 0x2d9   :  { %v2176_v59 = vpop.f32.mrb[56].mxu1  ;;  %v2265_v62 = vpop.f32.mrb[60].mxu0 }
 0x2da   :  { %v2177_v63 = vadd.f32 %v2176_v59, %v819_v51  ;;  %v2266_v0 = vadd.f32 %v2265_v62, %v827_v52  ;;  %v2178_v1 = vpop.f32.mrb[57].mxu1  ;;  %v2267_v2 = vpop.f32.mrb[61].mxu0 }
 0x2db   :  { %v2179_v3 = vadd.f32 %v2178_v1, %v823_v53  ;;  %v2268_v4 = vadd.f32 %v2267_v2, %v831_v54 }
 0x2dd   :  { %v2838_v5 = vpack.c.bf16 %v2179_v3, %v2177_v63  ;;  %v2839_v6 = vpack.c.bf16 %v2268_v4, %v2266_v0  ;;  %v2182_v7 = vpop.f32.mrb[58].mxu1  ;;  %v2271_v8 = vpop.f32.mrb[62].mxu0 }
 0x2de   :  { %v2183_v23 = vadd.f32 %v2182_v7, %v819_v51  ;;  %v2272_v61 = vadd.f32 %v2271_v8, %v827_v52  ;;  %v2184_v43 = vpop.f32.mrb[59].mxu1  ;;  %v2273_v13 = vpop.f32.mrb[63].mxu0 }
 0x2df   :  { %2686 = vst [vmem:[#allocation10 + $0x70] sm:$0xff] %v2838_v5  ;;  %2687 = vst [vmem:[#allocation10 + $0x78] sm:$0xff] %v2839_v6  ;;  %v2185_v55 = vadd.f32 %v2184_v43, %v823_v53  ;;  %v2274_v56 = vadd.f32 %v2273_v13, %v831_v54 }
 0x2e1   :  { %v2854_v60 = vpack.c.bf16 %v2185_v55, %v2183_v23  ;;  %v2855_v36 = vpack.c.bf16 %v2274_v56, %v2272_v61  ;;  %v2188_v57 = vpop.f32.mrb[60].mxu1  ;;  %v2277_v58 = vpop.f32.mrb[64].mxu0 }
 0x2e2   :  { %v2189_v9 = vadd.f32 %v2188_v57, %v819_v51  ;;  %v2278_v10 = vadd.f32 %v2277_v58, %v827_v52  ;;  %v2190_v11 = vpop.f32.mrb[61].mxu1  ;;  %v2279_v12 = vpop.f32.mrb[65].mxu0 }
 0x2e3   :  { %2702 = vst [vmem:[#allocation10 + $0xf0] sm:$0xff] %v2854_v60  ;;  %2703 = vst [vmem:[#allocation10 + $0xf8] sm:$0xff] %v2855_v36  ;;  %v2191_v14 = vadd.f32 %v2190_v11, %v823_v53  ;;  %v2280_v22 = vadd.f32 %v2279_v12, %v831_v54 }
 0x2e5   :  { %v2870_v15 = vpack.c.bf16 %v2191_v14, %v2189_v9  ;;  %v2871_v16 = vpack.c.bf16 %v2280_v22, %v2278_v10  ;;  %v2194_v17 = vpop.f32.mrb[62].mxu1  ;;  %v2283_v18 = vpop.f32.mrb[66].mxu0 }
 0x2e6   :  { %v2195_v19 = vadd.f32 %v2194_v17, %v819_v51  ;;  %v2284_v37 = vadd.f32 %v2283_v18, %v827_v52  ;;  %v2196_v20 = vpop.f32.mrb[63].mxu1  ;;  %v2285_v38 = vpop.f32.mrb[67].mxu0 }
 0x2e7   :  { %2718 = vst [vmem:[#allocation10 + $0x170] sm:$0xff] %v2870_v15  ;;  %2719 = vst [vmem:[#allocation10 + $0x178] sm:$0xff] %v2871_v16  ;;  %v2197_v39 = vadd.f32 %v2196_v20, %v823_v53  ;;  %v2286_v44 = vadd.f32 %v2285_v38, %v831_v54 }
 0x2e9   :  { %v2886_v21 = vpack.c.bf16 %v2197_v39, %v2195_v19  ;;  %v2887_v24 = vpack.c.bf16 %v2286_v44, %v2284_v37 }
 0x2eb   :  { %2734 = vst [vmem:[#allocation10 + $0x1f0] sm:$0xff] %v2886_v21  ;;  %2735 = vst [vmem:[#allocation10 + $0x1f8] sm:$0xff] %v2887_v24 }
 0x2ec   :  { %3522 = shalt.err (!%p3519_p8)
}
 0x2ed   :  { %s3523_s27 = scalar_lea.hbm %s3890_s5, 8192 }
 0x2ee   :  { %p3524_p9 = scmp.ne.s32.totalorder %s3890_s5, %s3523_s27  ;;  %p3527_p10 = scmp.lt.u32.totalorder %s3523_s27, %s3890_s5 }
 0x2f0   :  { %p3529_p11 = pnand %p3527_p10, %p3524_p9 }
 0x2f2   :  { %3532 = shalt.err (!%p3529_p11)
}
 0x2f3   :  { %s3549_s30 = smov 2048   ;;  %s3550_s6 = smov 128  }
 0x2f4   :  { %2747 = dma.vmem_to_hbm [thread:$0]  %s2742_s23, 8192, %s3890_s5, [#allocation4], %s3549_s30, %s3549_s30, %s3550_s6  }
 0x2f5   :  { %3539 = dma.done.wait [#allocation4], 8192  }
 0x2f6   :  { %3540 = vsyncadd [#allocation4], 4294959104 }
 0x2f7   :  { %2751 = vsyncpa [#allocation3], 1 }
 0x2f8   :  { %2752 = vsyncpa [#allocation6], 1 }
 0x2f9   :  { %2753 = vsyncpa [#allocation9], 1 }
 0x2fa   :  { %2754 = vsyncpa [#allocation4], 1 }

</bundles_post_ra>
